<compile_context>
chip_gen: v5e
topology: v5e:2x2
jax: 0.10.0
libtpu: 0.0.40
codegen_flags: <defaults>
</compile_context>

<pallas_src>
import functools
import math

import jax
import jax.numpy as jnp
from jax import lax
from jax.experimental import pallas as pl
from jax.experimental.pallas import tpu as pltpu


# ----------------------------------------------------------------------------
# Fused forward kernel (single grid step; all operands fully VMEM-resident)
# ----------------------------------------------------------------------------
def _fused_rope_mha_kernel(
    x_ref, qin_ref, kin_ref, vin_ref,        # activations, (B*S, D) each
    wqkv_ref, bqkv_ref,                      # block-diag (3D, 3D), (1, 3D)
    cos_ref, sin1_ref, sin2_ref,             # RoPE tables, (S, D) each
    wo_ref, bo_ref,                          # output projection
    g_ref, b_ref,                            # LayerNorm weight / bias
    o_ref,                                   # output, (B*S, D)
    *, batch, seq, heads, d_head, rope_d):
  B, S, H, Dh = batch, seq, heads, d_head
  D = H * Dh
  d2 = rope_d // 2
  f32 = jnp.float32

  # --- fused Q/K/V projection: one wide MXU pass ------------------------------
  # [query | key | value] @ blockdiag(Wq, Wk, Wv)  ->  [q | k | v]
  xin = jnp.concatenate(
      [qin_ref[...].astype(f32), kin_ref[...].astype(f32),
       vin_ref[...].astype(f32)], axis=-1)                    # (M, 3D)
  qkv = jnp.dot(xin, wqkv_ref[...], preferred_element_type=f32) + bqkv_ref[...]
  q = qkv[:, :D]
  k = qkv[:, D:2 * D]
  v = qkv[:, 2 * D:]

  # --- RoPE: MXU-free rotate-half ---------------------------------------------
  # The (S, D) tables already have the pass-through lanes set to cos=1/sin=0
  # and the per-head tiling baked in; they are only tiled over batch here.
  # sin1 is non-zero on the first-half rope lanes of each head, sin2 on the
  # second half, so
  #     out = x*cos - shift_left(x)*sin1 + shift_right(x)*sin2
  # reproduces torch's  cat([x_rope*cos + cat([-x[d/2:d], x[:d/2]])*sin, x_pass]).
  cos = jnp.concatenate([cos_ref[...]] * B, axis=0)           # (M, D), row = b*S+s
  sin1 = jnp.concatenate([sin1_ref[...]] * B, axis=0)
  sin2 = jnp.concatenate([sin2_ref[...]] * B, axis=0)

  def apply_rope(t):
    left = jnp.concatenate([t[:, d2:], t[:, :d2]], axis=-1)    # t[:, l + d2]
    right = jnp.concatenate([t[:, -d2:], t[:, :-d2]], axis=-1)  # t[:, l - d2]
    return t * cos - left * sin1 + right * sin2

  q = apply_rope(q)
  k = apply_rope(k)

  # --- causal attention, fully VMEM-resident ----------------------------------
  # The reference module flattens Q/K (B, H)-major but V (H, B)-major before
  # F.scaled_dot_product_attention and un-flattens the result as (H, B, ...).
  # Reproduced verbatim: the output block for (b, h) uses q/k from
  # (i // H, i % H) with i = h*B + b, and v from (h, b).
  scale = 1.0 / math.sqrt(Dh)
  row = lax.broadcasted_iota(jnp.int32, (S, S), 0)
  col = lax.broadcasted_iota(jnp.int32, (S, S), 1)
  causal = col <= row

  batch_rows = []
  for b in range(B):
    head_blocks = []
    for h in range(H):
      i = h * B + b
      bq, hq = divmod(i, H)
      qs = q[bq * S:(bq + 1) * S, hq * Dh:(hq + 1) * Dh]       # (S, Dh)
      ks = k[bq * S:(bq + 1) * S, hq * Dh:(hq + 1) * Dh]
      vs = v[b * S:(b + 1) * S, h * Dh:(h + 1) * Dh]
      s = jnp.dot(qs, ks.T, preferred_element_type=f32) * scale
      s = jnp.where(causal, s, -1e30)                          # is_causal=True
      m = jnp.max(s, axis=-1, keepdims=True)
      p = jnp.exp(s - m)
      p = p / jnp.sum(p, axis=-1, keepdims=True)
      head_blocks.append(jnp.dot(p, vs, preferred_element_type=f32))
    batch_rows.append(jnp.concatenate(head_blocks, axis=-1))   # (S, D)
  ctx = jnp.concatenate(batch_rows, axis=0)                    # (B*S, D)

  # --- residual + LayerNorm (eps = 1e-5) ---------------------------------------
  h_res = ctx + x_ref[...].astype(f32)
  mean = jnp.mean(h_res, axis=-1, keepdims=True)
  cen = h_res - mean
  var = jnp.mean(cen * cen, axis=-1, keepdims=True)
  ln = cen * lax.rsqrt(var + 1e-5) * g_ref[...] + b_ref[...]

  # --- output projection + residual, single lane-dense (B*S, D) store ---------
  out = jnp.dot(ln, wo_ref[...], preferred_element_type=f32) + bo_ref[...] + ln
  o_ref[...] = out.astype(o_ref.dtype)


# ----------------------------------------------------------------------------
# Host-side helpers
# ----------------------------------------------------------------------------
def _rope_tables(seq_len, d_head, num_heads, rope_per):
  """(S, D) cos/sin tables: per-head tiling, pass-through lanes (cos=1,sin=0),
  and the first/second rope-half selection pre-baked into sin1/sin2."""
  d = int(rope_per * d_head)
  d2 = d // 2
  theta = 1.0 / (10000.0 ** (jnp.arange(0, d, 2, dtype=jnp.float32) / d))
  pos = jnp.arange(seq_len, dtype=jnp.float32)
  idx = pos[:, None] * theta[None, :]                         # (S, d/2)
  idx2 = jnp.concatenate([idx, idx], axis=1)                  # (S, d)
  n_pass = d_head - d
  ones = jnp.ones((seq_len, n_pass), jnp.float32)
  zeros_pass = jnp.zeros((seq_len, n_pass), jnp.float32)
  zeros_half = jnp.zeros((seq_len, d2), jnp.float32)
  sin = jnp.sin(idx2)
  cos_h = jnp.concatenate([jnp.cos(idx2), ones], axis=1)                   # (S, Dh)
  sin1_h = jnp.concatenate([sin[:, :d2], zeros_half, zeros_pass], axis=1)  # (S, Dh)
  sin2_h = jnp.concatenate([zeros_half, sin[:, d2:], zeros_pass], axis=1)  # (S, Dh)
  tile = lambda t: jnp.tile(t, (1, num_heads))                             # (S, D)
  return tile(cos_h), tile(sin1_h), tile(sin2_h)


def rope_mha_forward(params, x, query, key, value, *, num_heads, rope_per=0.5):
  """Fused Pallas forward for RoPEMultiHeadAttention (one pallas_call)."""
  B, S, D = x.shape
  H = num_heads
  assert D % H == 0, "d_model % num_heads should be zero."
  Dh = D // H
  M = B * S
  d = int(rope_per * Dh)
  assert d > 0 and d % 2 == 0, "rope_per * d_head must be a positive even int"

  cos_t, sin1_t, sin2_t = _rope_tables(S, Dh, H, rope_per)

  # Block-diagonal fused QKV weight (inputs differ, so the (D, 3D) fusion is
  # realized as [q|k|v] @ blockdiag(Wq, Wk, Wv)).
  zero = jnp.zeros((D, D), jnp.float32)
  wqkv = jnp.concatenate([
      jnp.concatenate([params["wq"], zero, zero], axis=1),
      jnp.concatenate([zero, params["wk"], zero], axis=1),
      jnp.concatenate([zero, zero, params["wv"]], axis=1),
  ], axis=0)                                                   # (3D, 3D)
  bqkv = jnp.concatenate(
      [params["bq"], params["bk"], params["bv"]]).reshape(1, 3 * D)

  kernel = functools.partial(
      _fused_rope_mha_kernel, batch=B, seq=S, heads=H, d_head=Dh, rope_d=d)

  def full_spec(shape):
    return pl.BlockSpec(shape, lambda *_: (0,) * len(shape))

  out = pl.pallas_call(
      kernel,
      out_shape=jax.ShapeDtypeStruct((M, D), x.dtype),
      grid=(1,),
      in_specs=[
          full_spec((M, D)),            # x (residual input)
          full_spec((M, D)),            # query
          full_spec((M, D)),            # key
          full_spec((M, D)),            # value
          full_spec((3 * D, 3 * D)),    # fused QKV weight (block-diagonal)
          full_spec((1, 3 * D)),        # fused QKV bias
          full_spec((S, D)),            # RoPE cos table
          full_spec((S, D)),            # RoPE sin table (first half lanes)
          full_spec((S, D)),            # RoPE sin table (second half lanes)
          full_spec((D, D)),            # output projection weight
          full_spec((1, D)),            # output projection bias
          full_spec((1, D)),            # LayerNorm gamma
          full_spec((1, D)),            # LayerNorm beta
      ],
      out_specs=full_spec((M, D)),
      compiler_params=pltpu.CompilerParams(dimension_semantics=("arbitrary",)),
  )(
      x.reshape(M, D), query.reshape(M, D), key.reshape(M, D),
      value.reshape(M, D), wqkv, bqkv, cos_t, sin1_t, sin2_t,
      params["wo"], params["bo"].reshape(1, D),
      params["ln_g"].reshape(1, D), params["ln_b"].reshape(1, D),
  )
  return out.reshape(B, S, D)


# ----------------------------------------------------------------------------
# Pure-JAX reference (verbatim port of the PyTorch module) for validation
# ----------------------------------------------------------------------------
def _reference_forward(params, x, query, key, value, *, num_heads, rope_per=0.5):
  B, S, D = x.shape
  H = num_heads
  Dh = D // H
  hi = lax.Precision.HIGHEST

  def lin(t, w, b):
    return jnp.einsum("bsd,dn->bsn", t, w, precision=hi) + b

  q = lin(query, params["wq"], params["bq"]).reshape(B, S, H, Dh)
  k = lin(key, params["wk"], params["bk"]).reshape(B, S, H, Dh)
  v = lin(value, params["wv"], params["bv"]).reshape(B, S, H, Dh)

  def rope(t):                                    # t: (S, B, H, Dh)
    d = int(rope_per * Dh)
    d2 = d // 2
    theta = 1.0 / (10000.0 ** (jnp.arange(0, d, 2, dtype=jnp.float32) / d))
    pos = jnp.arange(S, dtype=jnp.float32)
    idx2 = jnp.concatenate([pos[:, None] * theta, pos[:, None] * theta], axis=1)
    cos = jnp.cos(idx2)[:, None, None, :]
    sin = jnp.sin(idx2)[:, None, None, :]
    xr, xp = t[..., :d], t[..., d:]
    neg = jnp.concatenate([-xr[..., d2:], xr[..., :d2]], axis=-1)
    return jnp.concatenate([xr * cos + neg * sin, xp], axis=-1)

  q = rope(jnp.transpose(q, (1, 0, 2, 3)))
  k = rope(jnp.transpose(k, (1, 0, 2, 3)))
  q = jnp.transpose(q, (1, 2, 0, 3)).reshape(B * H, S, Dh)
  k = jnp.transpose(k, (1, 2, 0, 3)).reshape(B * H, S, Dh)
  v = jnp.transpose(v, (2, 0, 1, 3)).reshape(H * B, S, Dh)

  s = jnp.einsum("isd,itd->ist", q, k, precision=hi) / math.sqrt(Dh)
  mask = jnp.tril(jnp.ones((S, S), bool))
  s = jnp.where(mask, s, -jnp.inf)
  p = jax.nn.softmax(s, axis=-1)
  ctx = jnp.einsum("ist,itd->isd", p, v, precision=hi)
  ctx = ctx.reshape(H, B, S, Dh)
  ctx = jnp.transpose(ctx, (1, 2, 0, 3)).reshape(B, S, D)

  h = ctx + x
  mean = jnp.mean(h, axis=-1, keepdims=True)
  var = jnp.mean((h - mean) ** 2, axis=-1, keepdims=True)
  ln = (h - mean) * lax.rsqrt(var + 1e-5) * params["ln_g"] + params["ln_b"]
  return jnp.einsum("bsd,dn->bsn", ln, params["wo"], precision=hi) + params["bo"] + ln


# ----------------------------------------------------------------------------
# Main
# ----------------------------------------------------------------------------
if __name__ == "__main__":
  B, S, D, H = 2, 8, 32, 4    # d_model=32, num_heads=4 -> d_head=8

  key0 = jax.random.PRNGKey(0)
  keys = jax.random.split(key0, 12)

  def init(k, shape):
    return 0.05 * jax.random.normal(k, shape, dtype=jnp.float32)

  # Linear weights are stored pre-transposed to (D_in, D_out); LayerNorm uses
  # PyTorch defaults (weight=1, bias=0).
  params = {
      "wq": init(keys[0], (D, D)), "bq": init(keys[1], (D,)),
      "wk": init(keys[2], (D, D)), "bk": init(keys[3], (D,)),
      "wv": init(keys[4], (D, D)), "bv": init(keys[5], (D,)),
      "wo": init(keys[6], (D, D)), "bo": init(keys[7], (D,)),
      "ln_g": jnp.ones((D,), jnp.float32),
      "ln_b": jnp.zeros((D,), jnp.float32),
  }

  x = jax.random.normal(keys[8], (B, S, D), jnp.float32)
  q_in = jax.random.normal(keys[9], (B, S, D), jnp.float32)
  k_in = jax.random.normal(keys[10], (B, S, D), jnp.float32)
  v_in = jax.random.normal(keys[11], (B, S, D), jnp.float32)

  fwd = jax.jit(functools.partial(rope_mha_forward, num_heads=H))
  out = fwd(params, x, q_in, k_in, v_in)
  jax.block_until_ready(out)

  assert out.shape == (B, S, D)
  assert bool(jnp.all(jnp.isfinite(out)))

  ref = _reference_forward(params, x, q_in, k_in, v_in, num_heads=H)
  err = float(jnp.max(jnp.abs(out - ref)))
  assert err < 2e-2, f"kernel mismatch vs pure-JAX reference: max abs err {err}"
  print("KERNEL_OK")
</pallas_src>

<mosaic_0001>
module attributes {stable_mosaic.version = 11 : i64} {
  func.func @_fused_rope_mha_kernel(%arg0: i32, %arg1: memref<16x32xf32, #tpu.memory_space<vmem>>, %arg2: memref<16x32xf32, #tpu.memory_space<vmem>>, %arg3: memref<16x32xf32, #tpu.memory_space<vmem>>, %arg4: memref<16x32xf32, #tpu.memory_space<vmem>>, %arg5: memref<96x96xf32, #tpu.memory_space<vmem>>, %arg6: memref<1x96xf32, #tpu.memory_space<vmem>>, %arg7: memref<8x32xf32, #tpu.memory_space<vmem>>, %arg8: memref<8x32xf32, #tpu.memory_space<vmem>>, %arg9: memref<8x32xf32, #tpu.memory_space<vmem>>, %arg10: memref<32x32xf32, #tpu.memory_space<vmem>>, %arg11: memref<1x32xf32, #tpu.memory_space<vmem>>, %arg12: memref<1x32xf32, #tpu.memory_space<vmem>>, %arg13: memref<1x32xf32, #tpu.memory_space<vmem>>, %arg14: memref<16x32xf32, #tpu.memory_space<vmem>>) attributes {dimension_semantics = [#tpu.dimension_semantics<arbitrary>], iteration_bounds = array<i64: 1>, scalar_prefetch = 0 : i64, scratch_operands = 0 : i64, tpu.core_type = #tpu.core_type<tc>, window_params = [{pipeline_mode = #tpu.pipeline_mode<synchronous>, transform_indices = @transform_0, window_bounds = array<i64: 16, 32>}, {pipeline_mode = #tpu.pipeline_mode<synchronous>, transform_indices = @transform_1, window_bounds = array<i64: 16, 32>}, {pipeline_mode = #tpu.pipeline_mode<synchronous>, transform_indices = @transform_2, window_bounds = array<i64: 16, 32>}, {pipeline_mode = #tpu.pipeline_mode<synchronous>, transform_indices = @transform_3, window_bounds = array<i64: 16, 32>}, {pipeline_mode = #tpu.pipeline_mode<synchronous>, transform_indices = @transform_4, window_bounds = array<i64: 96, 96>}, {pipeline_mode = #tpu.pipeline_mode<synchronous>, transform_indices = @transform_5, window_bounds = array<i64: 1, 96>}, {pipeline_mode = #tpu.pipeline_mode<synchronous>, transform_indices = @transform_6, window_bounds = array<i64: 8, 32>}, {pipeline_mode = #tpu.pipeline_mode<synchronous>, transform_indices = @transform_7, window_bounds = array<i64: 8, 32>}, {pipeline_mode = #tpu.pipeline_mode<synchronous>, transform_indices = @transform_8, window_bounds = array<i64: 8, 32>}, {pipeline_mode = #tpu.pipeline_mode<synchronous>, transform_indices = @transform_9, window_bounds = array<i64: 32, 32>}, {pipeline_mode = #tpu.pipeline_mode<synchronous>, transform_indices = @transform_10, window_bounds = array<i64: 1, 32>}, {pipeline_mode = #tpu.pipeline_mode<synchronous>, transform_indices = @transform_11, window_bounds = array<i64: 1, 32>}, {pipeline_mode = #tpu.pipeline_mode<synchronous>, transform_indices = @transform_12, window_bounds = array<i64: 1, 32>}, {pipeline_mode = #tpu.pipeline_mode<synchronous>, transform_indices = @transform_13, window_bounds = array<i64: 16, 32>}]} {
    %c0 = arith.constant 0 : index
    %c0_0 = arith.constant 0 : index
    %0 = vector.load %arg2[%c0, %c0_0] : memref<16x32xf32, #tpu.memory_space<vmem>>, vector<16x32xf32>
    %c0_1 = arith.constant 0 : index
    %c0_2 = arith.constant 0 : index
    %1 = vector.load %arg3[%c0_1, %c0_2] : memref<16x32xf32, #tpu.memory_space<vmem>>, vector<16x32xf32>
    %c0_3 = arith.constant 0 : index
    %c0_4 = arith.constant 0 : index
    %2 = vector.load %arg4[%c0_3, %c0_4] : memref<16x32xf32, #tpu.memory_space<vmem>>, vector<16x32xf32>
    %3 = tpu.concatenate %0, %1, %2 in 1 : vector<16x32xf32>, vector<16x32xf32>, vector<16x32xf32> -> vector<16x96xf32>
    %c0_5 = arith.constant 0 : index
    %c0_6 = arith.constant 0 : index
    %4 = vector.load %arg5[%c0_5, %c0_6] : memref<96x96xf32, #tpu.memory_space<vmem>>, vector<96x96xf32>
    %cst = arith.constant dense<0.000000e+00> : vector<16x96xf32>
    %5 = tpu.matmul %3, %4, %cst {dimension_numbers = #tpu.dot_dimension_numbers<[1], [0], [0], [1], [0, 0, 1, 1], [], []>} : vector<16x96xf32>, vector<96x96xf32>, vector<16x96xf32> -> vector<16x96xf32>
    %c0_7 = arith.constant 0 : index
    %c0_8 = arith.constant 0 : index
    %6 = vector.load %arg6[%c0_7, %c0_8] : memref<1x96xf32, #tpu.memory_space<vmem>>, vector<1x96xf32>
    %7 = vector.broadcast %6 : vector<1x96xf32> to vector<16x96xf32>
    %8 = arith.addf %5, %7 : vector<16x96xf32>
    %9 = vector.extract_strided_slice %8 {offsets = [0, 0], sizes = [16, 32], strides = [1, 1]} : vector<16x96xf32> to vector<16x32xf32>
    %10 = vector.extract_strided_slice %8 {offsets = [0, 32], sizes = [16, 32], strides = [1, 1]} : vector<16x96xf32> to vector<16x32xf32>
    %11 = vector.extract_strided_slice %8 {offsets = [0, 64], sizes = [16, 32], strides = [1, 1]} : vector<16x96xf32> to vector<16x32xf32>
    %c0_9 = arith.constant 0 : index
    %c0_10 = arith.constant 0 : index
    %12 = vector.load %arg7[%c0_9, %c0_10] : memref<8x32xf32, #tpu.memory_space<vmem>>, vector<8x32xf32>
    %13 = tpu.concatenate %12, %12 in 0 : vector<8x32xf32>, vector<8x32xf32> -> vector<16x32xf32>
    %c0_11 = arith.constant 0 : index
    %c0_12 = arith.constant 0 : index
    %14 = vector.load %arg8[%c0_11, %c0_12] : memref<8x32xf32, #tpu.memory_space<vmem>>, vector<8x32xf32>
    %15 = tpu.concatenate %14, %14 in 0 : vector<8x32xf32>, vector<8x32xf32> -> vector<16x32xf32>
    %c0_13 = arith.constant 0 : index
    %c0_14 = arith.constant 0 : index
    %16 = vector.load %arg9[%c0_13, %c0_14] : memref<8x32xf32, #tpu.memory_space<vmem>>, vector<8x32xf32>
    %17 = tpu.concatenate %16, %16 in 0 : vector<8x32xf32>, vector<8x32xf32> -> vector<16x32xf32>
    %18 = vector.extract_strided_slice %9 {offsets = [0, 2], sizes = [16, 30], strides = [1, 1]} : vector<16x32xf32> to vector<16x30xf32>
    %19 = vector.extract_strided_slice %9 {offsets = [0, 0], sizes = [16, 2], strides = [1, 1]} : vector<16x32xf32> to vector<16x2xf32>
    %20 = tpu.concatenate %18, %19 in 1 : vector<16x30xf32>, vector<16x2xf32> -> vector<16x32xf32>
    %21 = vector.extract_strided_slice %9 {offsets = [0, 30], sizes = [16, 2], strides = [1, 1]} : vector<16x32xf32> to vector<16x2xf32>
    %22 = vector.extract_strided_slice %9 {offsets = [0, 0], sizes = [16, 30], strides = [1, 1]} : vector<16x32xf32> to vector<16x30xf32>
    %23 = tpu.concatenate %21, %22 in 1 : vector<16x2xf32>, vector<16x30xf32> -> vector<16x32xf32>
    %24 = arith.mulf %9, %13 : vector<16x32xf32>
    %25 = arith.mulf %20, %15 : vector<16x32xf32>
    %26 = arith.subf %24, %25 : vector<16x32xf32>
    %27 = arith.mulf %23, %17 : vector<16x32xf32>
    %28 = arith.addf %26, %27 : vector<16x32xf32>
    %29 = vector.extract_strided_slice %10 {offsets = [0, 2], sizes = [16, 30], strides = [1, 1]} : vector<16x32xf32> to vector<16x30xf32>
    %30 = vector.extract_strided_slice %10 {offsets = [0, 0], sizes = [16, 2], strides = [1, 1]} : vector<16x32xf32> to vector<16x2xf32>
    %31 = tpu.concatenate %29, %30 in 1 : vector<16x30xf32>, vector<16x2xf32> -> vector<16x32xf32>
    %32 = vector.extract_strided_slice %10 {offsets = [0, 30], sizes = [16, 2], strides = [1, 1]} : vector<16x32xf32> to vector<16x2xf32>
    %33 = vector.extract_strided_slice %10 {offsets = [0, 0], sizes = [16, 30], strides = [1, 1]} : vector<16x32xf32> to vector<16x30xf32>
    %34 = tpu.concatenate %32, %33 in 1 : vector<16x2xf32>, vector<16x30xf32> -> vector<16x32xf32>
    %35 = arith.mulf %10, %13 : vector<16x32xf32>
    %36 = arith.mulf %31, %15 : vector<16x32xf32>
    %37 = arith.subf %35, %36 : vector<16x32xf32>
    %38 = arith.mulf %34, %17 : vector<16x32xf32>
    %39 = arith.addf %37, %38 : vector<16x32xf32>
    %40 = tpu.iota {dimensions = array<i32: 0>} : vector<8x8xi32>
    %41 = tpu.iota {dimensions = array<i32: 1>} : vector<8x8xi32>
    %42 = arith.cmpi sle, %41, %40 : vector<8x8xi32>
    %43 = vector.extract_strided_slice %28 {offsets = [0, 0], sizes = [8, 8], strides = [1, 1]} : vector<16x32xf32> to vector<8x8xf32>
    %44 = vector.extract_strided_slice %39 {offsets = [0, 0], sizes = [8, 8], strides = [1, 1]} : vector<16x32xf32> to vector<8x8xf32>
    %45 = vector.extract_strided_slice %11 {offsets = [0, 0], sizes = [8, 8], strides = [1, 1]} : vector<16x32xf32> to vector<8x8xf32>
    %46 = tpu.transpose %44, [1, 0] : vector<8x8xf32> -> vector<8x8xf32>
    %cst_15 = arith.constant dense<0.000000e+00> : vector<8x8xf32>
    %47 = tpu.matmul %43, %46, %cst_15 {dimension_numbers = #tpu.dot_dimension_numbers<[1], [0], [0], [1], [0, 0, 1, 1], [], []>} : vector<8x8xf32>, vector<8x8xf32>, vector<8x8xf32> -> vector<8x8xf32>
    %cst_16 = arith.constant 0.353553385 : f32
    %48 = vector.broadcast %cst_16 : f32 to vector<8x8xf32>
    %49 = arith.mulf %47, %48 : vector<8x8xf32>
    %cst_17 = arith.constant -1.000000e+30 : f32
    %50 = vector.broadcast %cst_17 : f32 to vector<8x8xf32>
    %51 = arith.select %42, %49, %50 : vector<8x8xi1>, vector<8x8xf32>
    %cst_18 = arith.constant dense<0xFF800000> : vector<8xf32>
    %52 = vector.multi_reduction <maximumf>, %51, %cst_18 [1] : vector<8x8xf32> to vector<8xf32>
    %53 = vector.shape_cast %52 : vector<8xf32> to vector<8x1xf32>
    %54 = vector.broadcast %53 : vector<8x1xf32> to vector<8x8xf32>
    %55 = arith.subf %51, %54 : vector<8x8xf32>
    %56 = math.exp %55 : vector<8x8xf32>
    %cst_19 = arith.constant dense<0.000000e+00> : vector<8xf32>
    %57 = vector.multi_reduction <add>, %56, %cst_19 [1] : vector<8x8xf32> to vector<8xf32>
    %58 = vector.shape_cast %57 : vector<8xf32> to vector<8x1xf32>
    %59 = vector.broadcast %58 : vector<8x1xf32> to vector<8x8xf32>
    %60 = arith.divf %56, %59 : vector<8x8xf32>
    %cst_20 = arith.constant dense<0.000000e+00> : vector<8x8xf32>
    %61 = tpu.matmul %60, %45, %cst_20 {dimension_numbers = #tpu.dot_dimension_numbers<[1], [0], [0], [1], [0, 0, 1, 1], [], []>} : vector<8x8xf32>, vector<8x8xf32>, vector<8x8xf32> -> vector<8x8xf32>
    %62 = vector.extract_strided_slice %28 {offsets = [0, 16], sizes = [8, 8], strides = [1, 1]} : vector<16x32xf32> to vector<8x8xf32>
    %63 = vector.extract_strided_slice %39 {offsets = [0, 16], sizes = [8, 8], strides = [1, 1]} : vector<16x32xf32> to vector<8x8xf32>
    %64 = vector.extract_strided_slice %11 {offsets = [0, 8], sizes = [8, 8], strides = [1, 1]} : vector<16x32xf32> to vector<8x8xf32>
    %65 = tpu.transpose %63, [1, 0] : vector<8x8xf32> -> vector<8x8xf32>
    %cst_21 = arith.constant dense<0.000000e+00> : vector<8x8xf32>
    %66 = tpu.matmul %62, %65, %cst_21 {dimension_numbers = #tpu.dot_dimension_numbers<[1], [0], [0], [1], [0, 0, 1, 1], [], []>} : vector<8x8xf32>, vector<8x8xf32>, vector<8x8xf32> -> vector<8x8xf32>
    %cst_22 = arith.constant 0.353553385 : f32
    %67 = vector.broadcast %cst_22 : f32 to vector<8x8xf32>
    %68 = arith.mulf %66, %67 : vector<8x8xf32>
    %cst_23 = arith.constant -1.000000e+30 : f32
    %69 = vector.broadcast %cst_23 : f32 to vector<8x8xf32>
    %70 = arith.select %42, %68, %69 : vector<8x8xi1>, vector<8x8xf32>
    %cst_24 = arith.constant dense<0xFF800000> : vector<8xf32>
    %71 = vector.multi_reduction <maximumf>, %70, %cst_24 [1] : vector<8x8xf32> to vector<8xf32>
    %72 = vector.shape_cast %71 : vector<8xf32> to vector<8x1xf32>
    %73 = vector.broadcast %72 : vector<8x1xf32> to vector<8x8xf32>
    %74 = arith.subf %70, %73 : vector<8x8xf32>
    %75 = math.exp %74 : vector<8x8xf32>
    %cst_25 = arith.constant dense<0.000000e+00> : vector<8xf32>
    %76 = vector.multi_reduction <add>, %75, %cst_25 [1] : vector<8x8xf32> to vector<8xf32>
    %77 = vector.shape_cast %76 : vector<8xf32> to vector<8x1xf32>
    %78 = vector.broadcast %77 : vector<8x1xf32> to vector<8x8xf32>
    %79 = arith.divf %75, %78 : vector<8x8xf32>
    %cst_26 = arith.constant dense<0.000000e+00> : vector<8x8xf32>
    %80 = tpu.matmul %79, %64, %cst_26 {dimension_numbers = #tpu.dot_dimension_numbers<[1], [0], [0], [1], [0, 0, 1, 1], [], []>} : vector<8x8xf32>, vector<8x8xf32>, vector<8x8xf32> -> vector<8x8xf32>
    %81 = vector.extract_strided_slice %28 {offsets = [8, 0], sizes = [8, 8], strides = [1, 1]} : vector<16x32xf32> to vector<8x8xf32>
    %82 = vector.extract_strided_slice %39 {offsets = [8, 0], sizes = [8, 8], strides = [1, 1]} : vector<16x32xf32> to vector<8x8xf32>
    %83 = vector.extract_strided_slice %11 {offsets = [0, 16], sizes = [8, 8], strides = [1, 1]} : vector<16x32xf32> to vector<8x8xf32>
    %84 = tpu.transpose %82, [1, 0] : vector<8x8xf32> -> vector<8x8xf32>
    %cst_27 = arith.constant dense<0.000000e+00> : vector<8x8xf32>
    %85 = tpu.matmul %81, %84, %cst_27 {dimension_numbers = #tpu.dot_dimension_numbers<[1], [0], [0], [1], [0, 0, 1, 1], [], []>} : vector<8x8xf32>, vector<8x8xf32>, vector<8x8xf32> -> vector<8x8xf32>
    %cst_28 = arith.constant 0.353553385 : f32
    %86 = vector.broadcast %cst_28 : f32 to vector<8x8xf32>
    %87 = arith.mulf %85, %86 : vector<8x8xf32>
    %cst_29 = arith.constant -1.000000e+30 : f32
    %88 = vector.broadcast %cst_29 : f32 to vector<8x8xf32>
    %89 = arith.select %42, %87, %88 : vector<8x8xi1>, vector<8x8xf32>
    %cst_30 = arith.constant dense<0xFF800000> : vector<8xf32>
    %90 = vector.multi_reduction <maximumf>, %89, %cst_30 [1] : vector<8x8xf32> to vector<8xf32>
    %91 = vector.shape_cast %90 : vector<8xf32> to vector<8x1xf32>
    %92 = vector.broadcast %91 : vector<8x1xf32> to vector<8x8xf32>
    %93 = arith.subf %89, %92 : vector<8x8xf32>
    %94 = math.exp %93 : vector<8x8xf32>
    %cst_31 = arith.constant dense<0.000000e+00> : vector<8xf32>
    %95 = vector.multi_reduction <add>, %94, %cst_31 [1] : vector<8x8xf32> to vector<8xf32>
    %96 = vector.shape_cast %95 : vector<8xf32> to vector<8x1xf32>
    %97 = vector.broadcast %96 : vector<8x1xf32> to vector<8x8xf32>
    %98 = arith.divf %94, %97 : vector<8x8xf32>
    %cst_32 = arith.constant dense<0.000000e+00> : vector<8x8xf32>
    %99 = tpu.matmul %98, %83, %cst_32 {dimension_numbers = #tpu.dot_dimension_numbers<[1], [0], [0], [1], [0, 0, 1, 1], [], []>} : vector<8x8xf32>, vector<8x8xf32>, vector<8x8xf32> -> vector<8x8xf32>
    %100 = vector.extract_strided_slice %28 {offsets = [8, 16], sizes = [8, 8], strides = [1, 1]} : vector<16x32xf32> to vector<8x8xf32>
    %101 = vector.extract_strided_slice %39 {offsets = [8, 16], sizes = [8, 8], strides = [1, 1]} : vector<16x32xf32> to vector<8x8xf32>
    %102 = vector.extract_strided_slice %11 {offsets = [0, 24], sizes = [8, 8], strides = [1, 1]} : vector<16x32xf32> to vector<8x8xf32>
    %103 = tpu.transpose %101, [1, 0] : vector<8x8xf32> -> vector<8x8xf32>
    %cst_33 = arith.constant dense<0.000000e+00> : vector<8x8xf32>
    %104 = tpu.matmul %100, %103, %cst_33 {dimension_numbers = #tpu.dot_dimension_numbers<[1], [0], [0], [1], [0, 0, 1, 1], [], []>} : vector<8x8xf32>, vector<8x8xf32>, vector<8x8xf32> -> vector<8x8xf32>
    %cst_34 = arith.constant 0.353553385 : f32
    %105 = vector.broadcast %cst_34 : f32 to vector<8x8xf32>
    %106 = arith.mulf %104, %105 : vector<8x8xf32>
    %cst_35 = arith.constant -1.000000e+30 : f32
    %107 = vector.broadcast %cst_35 : f32 to vector<8x8xf32>
    %108 = arith.select %42, %106, %107 : vector<8x8xi1>, vector<8x8xf32>
    %cst_36 = arith.constant dense<0xFF800000> : vector<8xf32>
    %109 = vector.multi_reduction <maximumf>, %108, %cst_36 [1] : vector<8x8xf32> to vector<8xf32>
    %110 = vector.shape_cast %109 : vector<8xf32> to vector<8x1xf32>
    %111 = vector.broadcast %110 : vector<8x1xf32> to vector<8x8xf32>
    %112 = arith.subf %108, %111 : vector<8x8xf32>
    %113 = math.exp %112 : vector<8x8xf32>
    %cst_37 = arith.constant dense<0.000000e+00> : vector<8xf32>
    %114 = vector.multi_reduction <add>, %113, %cst_37 [1] : vector<8x8xf32> to vector<8xf32>
    %115 = vector.shape_cast %114 : vector<8xf32> to vector<8x1xf32>
    %116 = vector.broadcast %115 : vector<8x1xf32> to vector<8x8xf32>
    %117 = arith.divf %113, %116 : vector<8x8xf32>
    %cst_38 = arith.constant dense<0.000000e+00> : vector<8x8xf32>
    %118 = tpu.matmul %117, %102, %cst_38 {dimension_numbers = #tpu.dot_dimension_numbers<[1], [0], [0], [1], [0, 0, 1, 1], [], []>} : vector<8x8xf32>, vector<8x8xf32>, vector<8x8xf32> -> vector<8x8xf32>
    %119 = tpu.concatenate %61, %80, %99, %118 in 1 : vector<8x8xf32>, vector<8x8xf32>, vector<8x8xf32>, vector<8x8xf32> -> vector<8x32xf32>
    %120 = vector.extract_strided_slice %28 {offsets = [0, 8], sizes = [8, 8], strides = [1, 1]} : vector<16x32xf32> to vector<8x8xf32>
    %121 = vector.extract_strided_slice %39 {offsets = [0, 8], sizes = [8, 8], strides = [1, 1]} : vector<16x32xf32> to vector<8x8xf32>
    %122 = vector.extract_strided_slice %11 {offsets = [8, 0], sizes = [8, 8], strides = [1, 1]} : vector<16x32xf32> to vector<8x8xf32>
    %123 = tpu.transpose %121, [1, 0] : vector<8x8xf32> -> vector<8x8xf32>
    %cst_39 = arith.constant dense<0.000000e+00> : vector<8x8xf32>
    %124 = tpu.matmul %120, %123, %cst_39 {dimension_numbers = #tpu.dot_dimension_numbers<[1], [0], [0], [1], [0, 0, 1, 1], [], []>} : vector<8x8xf32>, vector<8x8xf32>, vector<8x8xf32> -> vector<8x8xf32>
    %cst_40 = arith.constant 0.353553385 : f32
    %125 = vector.broadcast %cst_40 : f32 to vector<8x8xf32>
    %126 = arith.mulf %124, %125 : vector<8x8xf32>
    %cst_41 = arith.constant -1.000000e+30 : f32
    %127 = vector.broadcast %cst_41 : f32 to vector<8x8xf32>
    %128 = arith.select %42, %126, %127 : vector<8x8xi1>, vector<8x8xf32>
    %cst_42 = arith.constant dense<0xFF800000> : vector<8xf32>
    %129 = vector.multi_reduction <maximumf>, %128, %cst_42 [1] : vector<8x8xf32> to vector<8xf32>
    %130 = vector.shape_cast %129 : vector<8xf32> to vector<8x1xf32>
    %131 = vector.broadcast %130 : vector<8x1xf32> to vector<8x8xf32>
    %132 = arith.subf %128, %131 : vector<8x8xf32>
    %133 = math.exp %132 : vector<8x8xf32>
    %cst_43 = arith.constant dense<0.000000e+00> : vector<8xf32>
    %134 = vector.multi_reduction <add>, %133, %cst_43 [1] : vector<8x8xf32> to vector<8xf32>
    %135 = vector.shape_cast %134 : vector<8xf32> to vector<8x1xf32>
    %136 = vector.broadcast %135 : vector<8x1xf32> to vector<8x8xf32>
    %137 = arith.divf %133, %136 : vector<8x8xf32>
    %cst_44 = arith.constant dense<0.000000e+00> : vector<8x8xf32>
    %138 = tpu.matmul %137, %122, %cst_44 {dimension_numbers = #tpu.dot_dimension_numbers<[1], [0], [0], [1], [0, 0, 1, 1], [], []>} : vector<8x8xf32>, vector<8x8xf32>, vector<8x8xf32> -> vector<8x8xf32>
    %139 = vector.extract_strided_slice %28 {offsets = [0, 24], sizes = [8, 8], strides = [1, 1]} : vector<16x32xf32> to vector<8x8xf32>
    %140 = vector.extract_strided_slice %39 {offsets = [0, 24], sizes = [8, 8], strides = [1, 1]} : vector<16x32xf32> to vector<8x8xf32>
    %141 = vector.extract_strided_slice %11 {offsets = [8, 8], sizes = [8, 8], strides = [1, 1]} : vector<16x32xf32> to vector<8x8xf32>
    %142 = tpu.transpose %140, [1, 0] : vector<8x8xf32> -> vector<8x8xf32>
    %cst_45 = arith.constant dense<0.000000e+00> : vector<8x8xf32>
    %143 = tpu.matmul %139, %142, %cst_45 {dimension_numbers = #tpu.dot_dimension_numbers<[1], [0], [0], [1], [0, 0, 1, 1], [], []>} : vector<8x8xf32>, vector<8x8xf32>, vector<8x8xf32> -> vector<8x8xf32>
    %cst_46 = arith.constant 0.353553385 : f32
    %144 = vector.broadcast %cst_46 : f32 to vector<8x8xf32>
    %145 = arith.mulf %143, %144 : vector<8x8xf32>
    %cst_47 = arith.constant -1.000000e+30 : f32
    %146 = vector.broadcast %cst_47 : f32 to vector<8x8xf32>
    %147 = arith.select %42, %145, %146 : vector<8x8xi1>, vector<8x8xf32>
    %cst_48 = arith.constant dense<0xFF800000> : vector<8xf32>
    %148 = vector.multi_reduction <maximumf>, %147, %cst_48 [1] : vector<8x8xf32> to vector<8xf32>
    %149 = vector.shape_cast %148 : vector<8xf32> to vector<8x1xf32>
    %150 = vector.broadcast %149 : vector<8x1xf32> to vector<8x8xf32>
    %151 = arith.subf %147, %150 : vector<8x8xf32>
    %152 = math.exp %151 : vector<8x8xf32>
    %cst_49 = arith.constant dense<0.000000e+00> : vector<8xf32>
    %153 = vector.multi_reduction <add>, %152, %cst_49 [1] : vector<8x8xf32> to vector<8xf32>
    %154 = vector.shape_cast %153 : vector<8xf32> to vector<8x1xf32>
    %155 = vector.broadcast %154 : vector<8x1xf32> to vector<8x8xf32>
    %156 = arith.divf %152, %155 : vector<8x8xf32>
    %cst_50 = arith.constant dense<0.000000e+00> : vector<8x8xf32>
    %157 = tpu.matmul %156, %141, %cst_50 {dimension_numbers = #tpu.dot_dimension_numbers<[1], [0], [0], [1], [0, 0, 1, 1], [], []>} : vector<8x8xf32>, vector<8x8xf32>, vector<8x8xf32> -> vector<8x8xf32>
    %158 = vector.extract_strided_slice %28 {offsets = [8, 8], sizes = [8, 8], strides = [1, 1]} : vector<16x32xf32> to vector<8x8xf32>
    %159 = vector.extract_strided_slice %39 {offsets = [8, 8], sizes = [8, 8], strides = [1, 1]} : vector<16x32xf32> to vector<8x8xf32>
    %160 = vector.extract_strided_slice %11 {offsets = [8, 16], sizes = [8, 8], strides = [1, 1]} : vector<16x32xf32> to vector<8x8xf32>
    %161 = tpu.transpose %159, [1, 0] : vector<8x8xf32> -> vector<8x8xf32>
    %cst_51 = arith.constant dense<0.000000e+00> : vector<8x8xf32>
    %162 = tpu.matmul %158, %161, %cst_51 {dimension_numbers = #tpu.dot_dimension_numbers<[1], [0], [0], [1], [0, 0, 1, 1], [], []>} : vector<8x8xf32>, vector<8x8xf32>, vector<8x8xf32> -> vector<8x8xf32>
    %cst_52 = arith.constant 0.353553385 : f32
    %163 = vector.broadcast %cst_52 : f32 to vector<8x8xf32>
    %164 = arith.mulf %162, %163 : vector<8x8xf32>
    %cst_53 = arith.constant -1.000000e+30 : f32
    %165 = vector.broadcast %cst_53 : f32 to vector<8x8xf32>
    %166 = arith.select %42, %164, %165 : vector<8x8xi1>, vector<8x8xf32>
    %cst_54 = arith.constant dense<0xFF800000> : vector<8xf32>
    %167 = vector.multi_reduction <maximumf>, %166, %cst_54 [1] : vector<8x8xf32> to vector<8xf32>
    %168 = vector.shape_cast %167 : vector<8xf32> to vector<8x1xf32>
    %169 = vector.broadcast %168 : vector<8x1xf32> to vector<8x8xf32>
    %170 = arith.subf %166, %169 : vector<8x8xf32>
    %171 = math.exp %170 : vector<8x8xf32>
    %cst_55 = arith.constant dense<0.000000e+00> : vector<8xf32>
    %172 = vector.multi_reduction <add>, %171, %cst_55 [1] : vector<8x8xf32> to vector<8xf32>
    %173 = vector.shape_cast %172 : vector<8xf32> to vector<8x1xf32>
    %174 = vector.broadcast %173 : vector<8x1xf32> to vector<8x8xf32>
    %175 = arith.divf %171, %174 : vector<8x8xf32>
    %cst_56 = arith.constant dense<0.000000e+00> : vector<8x8xf32>
    %176 = tpu.matmul %175, %160, %cst_56 {dimension_numbers = #tpu.dot_dimension_numbers<[1], [0], [0], [1], [0, 0, 1, 1], [], []>} : vector<8x8xf32>, vector<8x8xf32>, vector<8x8xf32> -> vector<8x8xf32>
    %177 = vector.extract_strided_slice %28 {offsets = [8, 24], sizes = [8, 8], strides = [1, 1]} : vector<16x32xf32> to vector<8x8xf32>
    %178 = vector.extract_strided_slice %39 {offsets = [8, 24], sizes = [8, 8], strides = [1, 1]} : vector<16x32xf32> to vector<8x8xf32>
    %179 = vector.extract_strided_slice %11 {offsets = [8, 24], sizes = [8, 8], strides = [1, 1]} : vector<16x32xf32> to vector<8x8xf32>
    %180 = tpu.transpose %178, [1, 0] : vector<8x8xf32> -> vector<8x8xf32>
    %cst_57 = arith.constant dense<0.000000e+00> : vector<8x8xf32>
    %181 = tpu.matmul %177, %180, %cst_57 {dimension_numbers = #tpu.dot_dimension_numbers<[1], [0], [0], [1], [0, 0, 1, 1], [], []>} : vector<8x8xf32>, vector<8x8xf32>, vector<8x8xf32> -> vector<8x8xf32>
    %cst_58 = arith.constant 0.353553385 : f32
    %182 = vector.broadcast %cst_58 : f32 to vector<8x8xf32>
    %183 = arith.mulf %181, %182 : vector<8x8xf32>
    %cst_59 = arith.constant -1.000000e+30 : f32
    %184 = vector.broadcast %cst_59 : f32 to vector<8x8xf32>
    %185 = arith.select %42, %183, %184 : vector<8x8xi1>, vector<8x8xf32>
    %cst_60 = arith.constant dense<0xFF800000> : vector<8xf32>
    %186 = vector.multi_reduction <maximumf>, %185, %cst_60 [1] : vector<8x8xf32> to vector<8xf32>
    %187 = vector.shape_cast %186 : vector<8xf32> to vector<8x1xf32>
    %188 = vector.broadcast %187 : vector<8x1xf32> to vector<8x8xf32>
    %189 = arith.subf %185, %188 : vector<8x8xf32>
    %190 = math.exp %189 : vector<8x8xf32>
    %cst_61 = arith.constant dense<0.000000e+00> : vector<8xf32>
    %191 = vector.multi_reduction <add>, %190, %cst_61 [1] : vector<8x8xf32> to vector<8xf32>
    %192 = vector.shape_cast %191 : vector<8xf32> to vector<8x1xf32>
    %193 = vector.broadcast %192 : vector<8x1xf32> to vector<8x8xf32>
    %194 = arith.divf %190, %193 : vector<8x8xf32>
    %cst_62 = arith.constant dense<0.000000e+00> : vector<8x8xf32>
    %195 = tpu.matmul %194, %179, %cst_62 {dimension_numbers = #tpu.dot_dimension_numbers<[1], [0], [0], [1], [0, 0, 1, 1], [], []>} : vector<8x8xf32>, vector<8x8xf32>, vector<8x8xf32> -> vector<8x8xf32>
    %196 = tpu.concatenate %138, %157, %176, %195 in 1 : vector<8x8xf32>, vector<8x8xf32>, vector<8x8xf32>, vector<8x8xf32> -> vector<8x32xf32>
    %197 = tpu.concatenate %119, %196 in 0 : vector<8x32xf32>, vector<8x32xf32> -> vector<16x32xf32>
    %c0_63 = arith.constant 0 : index
    %c0_64 = arith.constant 0 : index
    %198 = vector.load %arg1[%c0_63, %c0_64] : memref<16x32xf32, #tpu.memory_space<vmem>>, vector<16x32xf32>
    %199 = arith.addf %197, %198 : vector<16x32xf32>
    %cst_65 = arith.constant dense<0.000000e+00> : vector<16xf32>
    %200 = vector.multi_reduction <add>, %199, %cst_65 [1] : vector<16x32xf32> to vector<16xf32>
    %201 = vector.shape_cast %200 : vector<16xf32> to vector<16x1xf32>
    %cst_66 = arith.constant 3.200000e+01 : f32
    %202 = vector.broadcast %cst_66 : f32 to vector<16x1xf32>
    %203 = arith.divf %201, %202 : vector<16x1xf32>
    %204 = vector.broadcast %203 : vector<16x1xf32> to vector<16x32xf32>
    %205 = arith.subf %199, %204 : vector<16x32xf32>
    %206 = arith.mulf %205, %205 : vector<16x32xf32>
    %cst_67 = arith.constant dense<0.000000e+00> : vector<16xf32>
    %207 = vector.multi_reduction <add>, %206, %cst_67 [1] : vector<16x32xf32> to vector<16xf32>
    %208 = vector.shape_cast %207 : vector<16xf32> to vector<16x1xf32>
    %cst_68 = arith.constant 3.200000e+01 : f32
    %209 = vector.broadcast %cst_68 : f32 to vector<16x1xf32>
    %210 = arith.divf %208, %209 : vector<16x1xf32>
    %cst_69 = arith.constant 9.99999974E-6 : f32
    %211 = vector.broadcast %cst_69 : f32 to vector<16x1xf32>
    %212 = arith.addf %210, %211 : vector<16x1xf32>
    %213 = math.rsqrt %212 : vector<16x1xf32>
    %214 = vector.broadcast %213 : vector<16x1xf32> to vector<16x32xf32>
    %215 = arith.mulf %205, %214 : vector<16x32xf32>
    %c0_70 = arith.constant 0 : index
    %c0_71 = arith.constant 0 : index
    %216 = vector.load %arg12[%c0_70, %c0_71] : memref<1x32xf32, #tpu.memory_space<vmem>>, vector<1x32xf32>
    %217 = vector.broadcast %216 : vector<1x32xf32> to vector<16x32xf32>
    %218 = arith.mulf %215, %217 : vector<16x32xf32>
    %c0_72 = arith.constant 0 : index
    %c0_73 = arith.constant 0 : index
    %219 = vector.load %arg13[%c0_72, %c0_73] : memref<1x32xf32, #tpu.memory_space<vmem>>, vector<1x32xf32>
    %220 = vector.broadcast %219 : vector<1x32xf32> to vector<16x32xf32>
    %221 = arith.addf %218, %220 : vector<16x32xf32>
    %c0_74 = arith.constant 0 : index
    %c0_75 = arith.constant 0 : index
    %222 = vector.load %arg10[%c0_74, %c0_75] : memref<32x32xf32, #tpu.memory_space<vmem>>, vector<32x32xf32>
    %cst_76 = arith.constant dense<0.000000e+00> : vector<16x32xf32>
    %223 = tpu.matmul %221, %222, %cst_76 {dimension_numbers = #tpu.dot_dimension_numbers<[1], [0], [0], [1], [0, 0, 1, 1], [], []>} : vector<16x32xf32>, vector<32x32xf32>, vector<16x32xf32> -> vector<16x32xf32>
    %c0_77 = arith.constant 0 : index
    %c0_78 = arith.constant 0 : index
    %224 = vector.load %arg11[%c0_77, %c0_78] : memref<1x32xf32, #tpu.memory_space<vmem>>, vector<1x32xf32>
    %225 = vector.broadcast %224 : vector<1x32xf32> to vector<16x32xf32>
    %226 = arith.addf %223, %225 : vector<16x32xf32>
    %227 = arith.addf %226, %221 : vector<16x32xf32>
    %c0_79 = arith.constant 0 : index
    %c0_80 = arith.constant 0 : index
    %228 = vector.load %arg14[%c0_79, %c0_80] : memref<16x32xf32, #tpu.memory_space<vmem>>, vector<16x32xf32>
    tpu.vector_store %arg14[%c0_79, %c0_80], %227 {strides = array<i32>} : memref<16x32xf32, #tpu.memory_space<vmem>>, vector<16x32xf32>,
    return
  }
  func.func @transform_0(%arg0: i32) -> (i32, i32) {
    %c0_i32 = arith.constant 0 : i32
    %c0_i32_0 = arith.constant 0 : i32
    %c0_i32_1 = arith.constant 0 : i32
    return %c0_i32, %c0_i32_0 : i32, i32
  }
  func.func @transform_1(%arg0: i32) -> (i32, i32) {
    %c0_i32 = arith.constant 0 : i32
    %c0_i32_0 = arith.constant 0 : i32
    %c0_i32_1 = arith.constant 0 : i32
    return %c0_i32, %c0_i32_0 : i32, i32
  }
  func.func @transform_2(%arg0: i32) -> (i32, i32) {
    %c0_i32 = arith.constant 0 : i32
    %c0_i32_0 = arith.constant 0 : i32
    %c0_i32_1 = arith.constant 0 : i32
    return %c0_i32, %c0_i32_0 : i32, i32
  }
  func.func @transform_3(%arg0: i32) -> (i32, i32) {
    %c0_i32 = arith.constant 0 : i32
    %c0_i32_0 = arith.constant 0 : i32
    %c0_i32_1 = arith.constant 0 : i32
    return %c0_i32, %c0_i32_0 : i32, i32
  }
  func.func @transform_4(%arg0: i32) -> (i32, i32) {
    %c0_i32 = arith.constant 0 : i32
    %c0_i32_0 = arith.constant 0 : i32
    %c0_i32_1 = arith.constant 0 : i32
    return %c0_i32, %c0_i32_0 : i32, i32
  }
  func.func @transform_5(%arg0: i32) -> (i32, i32) {
    %c0_i32 = arith.constant 0 : i32
    %c0_i32_0 = arith.constant 0 : i32
    %c0_i32_1 = arith.constant 0 : i32
    return %c0_i32, %c0_i32_0 : i32, i32
  }
  func.func @transform_6(%arg0: i32) -> (i32, i32) {
    %c0_i32 = arith.constant 0 : i32
    %c0_i32_0 = arith.constant 0 : i32
    %c0_i32_1 = arith.constant 0 : i32
    return %c0_i32, %c0_i32_0 : i32, i32
  }
  func.func @transform_7(%arg0: i32) -> (i32, i32) {
    %c0_i32 = arith.constant 0 : i32
    %c0_i32_0 = arith.constant 0 : i32
    %c0_i32_1 = arith.constant 0 : i32
    return %c0_i32, %c0_i32_0 : i32, i32
  }
  func.func @transform_8(%arg0: i32) -> (i32, i32) {
    %c0_i32 = arith.constant 0 : i32
    %c0_i32_0 = arith.constant 0 : i32
    %c0_i32_1 = arith.constant 0 : i32
    return %c0_i32, %c0_i32_0 : i32, i32
  }
  func.func @transform_9(%arg0: i32) -> (i32, i32) {
    %c0_i32 = arith.constant 0 : i32
    %c0_i32_0 = arith.constant 0 : i32
    %c0_i32_1 = arith.constant 0 : i32
    return %c0_i32, %c0_i32_0 : i32, i32
  }
  func.func @transform_10(%arg0: i32) -> (i32, i32) {
    %c0_i32 = arith.constant 0 : i32
    %c0_i32_0 = arith.constant 0 : i32
    %c0_i32_1 = arith.constant 0 : i32
    return %c0_i32, %c0_i32_0 : i32, i32
  }
  func.func @transform_11(%arg0: i32) -> (i32, i32) {
    %c0_i32 = arith.constant 0 : i32
    %c0_i32_0 = arith.constant 0 : i32
    %c0_i32_1 = arith.constant 0 : i32
    return %c0_i32, %c0_i32_0 : i32, i32
  }
  func.func @transform_12(%arg0: i32) -> (i32, i32) {
    %c0_i32 = arith.constant 0 : i32
    %c0_i32_0 = arith.constant 0 : i32
    %c0_i32_1 = arith.constant 0 : i32
    return %c0_i32, %c0_i32_0 : i32, i32
  }
  func.func @transform_13(%arg0: i32) -> (i32, i32) {
    %c0_i32 = arith.constant 0 : i32
    %c0_i32_0 = arith.constant 0 : i32
    %c0_i32_1 = arith.constant 0 : i32
    return %c0_i32, %c0_i32_0 : i32, i32
  }
}

</mosaic_0001>

<bundles_post_ra>
// kernel: tile.24
= control target key start
LH: loop header
LB: loop body
LE: loop exit
PB: predicated region body
PF: predicated region fallthrough
CT: control target
= control target key end

     0   :  { %vm36_vm0 = vcmask 1047556   ;;  %s81_s22 = smov 8   ;;  %s82_s23 = smov 16   ;;  %vm38_vm1 = vcmask 64512   ;;  %vm48_vm2 = vcmask 261312   ;;  %vm58_vm3 = vcmask 195712   ;;  %s133_s0 = inlined_call_operand.vmem [shape: f32[8,4,8], index: 0, kind: input, shape index: {}]   ;;  %s134_s1 = inlined_call_operand.vmem [shape: f32[8,32], index: 1, kind: output, shape index: {}]  }
   0x1   :  { %v70_v0 = vld [vmem:[%s133_s0 + $0x1c] sm:$0xf]  ;;  %v71_v1 = vld [vmem:[%s133_s0 + $0x18] sm:$0xf]  ;;  %v72_v2 = vld [vmem:[%s133_s0 + $0x14] sm:$0xf] }
   0x2   :  { %7 = vst [vmem:[#allocation0 + $0x38] sm:$0xf] %v70_v0  ;;  %v73_v3 = vld [vmem:[%s133_s0 + $0x10] sm:$0xf]  ;;  %v74_v4 = vld [vmem:[%s133_s0 + $0xc] sm:$0xf] }
   0x3   :  { %11 = vst [vmem:[#allocation0 + $0x30] sm:$0xf] %v71_v1  ;;  %v75_v5 = vld [vmem:[%s133_s0 + $0x8] sm:$0xf]  ;;  %v76_v6 = vld [vmem:[%s133_s0 + $0x4] sm:$0xf] }
   0x4   :  { %15 = vst [vmem:[#allocation0 + $0x28] sm:$0xf] %v72_v2  ;;  %v32_v7 = vld [vmem:[%s133_s0] sm:$0xf]  ;;  %s80_s0 = smov 24   ;;  %vm68_vm4 = vcmask 130112  }
   0x5   :  { %19 = vst [vmem:[#allocation0 + $0x20] sm:$0xf] %v73_v3 }
   0x6   :  { %23 = vst [vmem:[#allocation0 + $0x18] sm:$0xf] %v74_v4 }
   0x7   :  { %27 = vst [vmem:[#allocation0 + $0x10] sm:$0xf] %v75_v5 }
   0x8   :  { %31 = vst [vmem:[#allocation0 + $0x8] sm:$0xf] %v76_v6 }
   0x9   :  { %33 = vst [vmem:[#allocation0] sm:$0xf] %v32_v7 }
   0xc   :  { %v43_v8 = vld [vmem:[#allocation0 + $0x3] ss:$8 sm:$0xf0]   ;;  %v63_v9 = vld [vmem:[#allocation0 + $0x1] ss:$8 sm:$0xf0]  }
   0xd   :  { %v53_v15 = vld [vmem:[#allocation0 + $0x2] ss:$8 sm:$0xf0]   ;;  %v35_v18 = vld [vmem:[#allocation0] ss:$8 sm:$0xf0]  }
  0x10   :  { %v41_v10 = vld [vmem:[#allocation0 + $0x3] ss:$8 sm:$0xf]   ;;  %v61_v12 = vld [vmem:[#allocation0 + $0x1] ss:$8 sm:$0xf]  }
  0x11   :  { %v45_v11 = vsel %vm36_vm0, %v43_v8, %v41_v10  ;;  %v65_v13 = vsel %vm36_vm0, %v63_v9, %v61_v12  ;;  %v51_v14 = vld [vmem:[#allocation0 + $0x2] ss:$8 sm:$0xf]   ;;  %v34_v17 = vld [vmem:[#allocation0] ss:$8 sm:$0xf]  }
  0x12   :  { %46 = vrot.lane.b32.xlu0 %v45_v11, %s80_s0  ;;  %66 = vrot.lane.b32.xlu1 %v65_v13, %s81_s22  ;;  %v55_v16 = vsel %vm36_vm0, %v53_v15, %v51_v14  ;;  %v37_v19 = vsel %vm36_vm0, %v35_v18, %v34_v17 }
  0x13   :  { %39 = vst.msk [vmem:[%s134_s1] sm:$0xff] %vm38_vm1, %v37_v19  }
  0x1a   :  { %56 = vrot.lane.b32.xlu0 %v55_v16, %s82_s23 }
  0x84   :  { %v47_v20 = vpop.permute.xlu0 %46   ;;  %v67_v21 = vpop.permute.xlu1 %66  }
  0x85   :  { %49 = vst.msk [vmem:[%s134_s1] sm:$0xff] %vm48_vm2, %v47_v20  }
  0x8c   :  { %v57_v22 = vpop.permute.xlu0 %56  }
  0x8d   :  { %59 = vst.msk [vmem:[%s134_s1] sm:$0xff] %vm58_vm3, %v57_v22  }
  0x8e   :  { %69 = vst.msk [vmem:[%s134_s1] sm:$0xff] %vm68_vm4, %v67_v21  }

// kernel: rope_mha_forward.1
= control target key start
LH: loop header
LB: loop body
LE: loop exit
PB: predicated region body
PF: predicated region fallthrough
CT: control target
= control target key end

     0   :  { %s1134_s29 = smov 32   ;;  %s1554_s0 = inlined_call_operand.vmem [shape: f32[16,32], index: 0, kind: input, shape index: {}]   ;;  %s1555_s1 = inlined_call_operand.vmem [shape: f32[16,32], index: 1, kind: input, shape index: {}]   ;;  %s1556_s2 = inlined_call_operand.vmem [shape: f32[16,32], index: 2, kind: input, shape index: {}]   ;;  %s1557_s3 = inlined_call_operand.vmem [shape: f32[16,32], index: 3, kind: input, shape index: {}]   ;;  %s1558_s4 = inlined_call_operand.vmem [shape: f32[96,96], index: 4, kind: input, shape index: {}]   ;;  %s1559_s5 = inlined_call_operand.vmem [shape: f32[1,96], index: 5, kind: input, shape index: {}]   ;;  %s1560_s6 = inlined_call_operand.vmem [shape: f32[8,32], index: 6, kind: input, shape index: {}]   ;;  %s1561_s7 = inlined_call_operand.vmem [shape: f32[8,32], index: 7, kind: input, shape index: {}]   ;;  %s1562_s8 = inlined_call_operand.vmem [shape: f32[8,32], index: 8, kind: input, shape index: {}]   ;;  %s1563_s9 = inlined_call_operand.vmem [shape: f32[32,32], index: 9, kind: input, shape index: {}]   ;;  %s1564_s10 = inlined_call_operand.vmem [shape: f32[1,32], index: 10, kind: input, shape index: {}]   ;;  %s1565_s11 = inlined_call_operand.vmem [shape: f32[1,32], index: 11, kind: input, shape index: {}]   ;;  %s1566_s12 = inlined_call_operand.vmem [shape: f32[1,32], index: 12, kind: input, shape index: {}]   ;;  %s1567_s13 = inlined_call_operand.hbm [shape: f32[16,32], index: 13, kind: output, shape index: {}]  }
   0x1   :  { %v47_v0 = vld [vmem:[%s1556_s2] sm:$0xff]  ;;  %v84_v1 = vld [vmem:[%s1558_s4 + $0x58] sm:$0xff]  ;;  %v83_v2 = vld [vmem:[%s1558_s4 + $0x50] sm:$0xff] }
   0x2   :  { %53 = vrot.lane.b32.xlu0 %v47_v0, %s1134_s29  ;;  %100 = vmatpush.msra.mxu0 %v84_v1  ;;  %v82_v3 = vld [vmem:[%s1558_s4 + $0x48] sm:$0xff]  ;;  %v81_v4 = vld [vmem:[%s1558_s4 + $0x40] sm:$0xff] }
   0x4   :  { %101 = vmatpush.msra.mxu0 %v83_v2 }
   0x5   :  { %18 = vsyncpa [#allocation3], 0  ;;  %v49_v5 = vld [vmem:[%s1557_s3] sm:$0xff]  ;;  %v80_v6 = vld [vmem:[%s1558_s4 + $0x38] sm:$0xff]  ;;  %s1135_s25 = smov 64   ;;  %vm67_vm0 = vcmask 261120   ;;  %v210_v58 = vlaneseq }
   0x6   :  { %102 = vmatpush.msra.mxu0 %v82_v3  ;;  %v79_v7 = vld [vmem:[%s1558_s4 + $0x30] sm:$0xff]  ;;  %v78_v8 = vld [vmem:[%s1558_s4 + $0x28] sm:$0xff]  ;;  %v77_v9 = vld [vmem:[%s1558_s4 + $0x20] sm:$0xff]  ;;  %vm70_vm1 = vcmask 523264   ;;  %vm89_vm2 = vcmask 785408   ;;  %s1136_s27 = smov 30  }
   0x7   :  { %v76_v10 = vld [vmem:[%s1558_s4 + $0x18] sm:$0xff]  ;;  %v75_v11 = vld [vmem:[%s1558_s4 + $0x10] sm:$0xff]  ;;  %v74_v12 = vld [vmem:[%s1558_s4 + $0x8] sm:$0xff]  ;;  %s1137_s28 = smov 98   ;;  %s1138_s30 = smov 126   ;;  %vm151_vm3 = vcmask 15360  }
   0x8   :  { %103 = vmatpush.msra.mxu0 %v81_v4  ;;  %v73_v13 = vld [vmem:[%s1558_s4] sm:$0xff]  ;;  %s1139_s14 = smov 66   ;;  %vm136_vm4 = vcmask 244736   ;;  %v48_v39 = vld [vmem:[%s1556_s2 + $0x8] sm:$0xff]  ;;  %s1143_s21 = smov 80   ;;  %vm218_vm5 = vcmask 64512  }
   0x9   :  { %v1275_v14 = vld [vmem:[%s1560_s6] sm:$0xff]  ;;  %v50_v43 = vld [vmem:[%s1557_s3 + $0x8] sm:$0xff]  ;;  %s1144_s2 = smov 112   ;;  %v211_v59 = vshrl.u32 %v210_v58, 7  ;;  %v213_v60 = vand.u32 127, %v210_v58  ;;  %s1147_s26 = smov 40  }
   0xa   :  { %61 = vrot.lane.b32.xlu0 %v49_v5, %s1135_s25  ;;  %104 = vmatpush.msra.mxu0 %v80_v6  ;;  %v45_v16 = vld [vmem:[%s1555_s1] sm:$0xff]  ;;  %v46_v54 = vld [vmem:[%s1555_s1 + $0x8] sm:$0xff]  ;;  %s1145_s1 = smov 56   ;;  %s1148_s4 = smov 88  }
   0xb   :  { %v1288_v20 = vld [vmem:[%s1559_s5] ss:$0 sm:$0xff]  ;;  %s1140_s5 = smov 94   ;;  %vm1361_vm6 = vcmp.le.s32.totalorder %v213_v60, %v211_v59  ;;  %s1149_s6 = smov 120  }
   0xc   :  { %105 = vmatpush.msra.mxu0 %v79_v7  ;;  %v1306_v24 = vld [vmem:[%s1562_s8] sm:$0xff]  ;;  %s1141_s8 = smov 2  }
   0xd   :  { %v1314_v30 = vld [vmem:[%s1561_s7] sm:$0xff]  ;;  %s1142_s7 = smov 96  }
   0xe   :  { %106 = vmatpush.msra.mxu0 %v78_v8 }
  0x10   :  { %107 = vmatpush.msra.mxu0 %v77_v9 }
  0x12   :  { %108 = vmatpush.msra.mxu0 %v76_v10  ;;  %181 = vrot.lane.b32.xlu0 %v1275_v14, %s1134_s29 }
  0x14   :  { %109 = vmatpush.msra.mxu0 %v75_v11 }
  0x16   :  { %110 = vmatpush.msra.mxu0 %v74_v12 }
  0x18   :  { %111 = vmatpush.msra.mxu0 %v73_v13 }
  0x74   :  { %v54_v15 = vpop.permute.xlu0 %53 }
  0x75   :  { %v68_v17 = vsel %vm67_vm0, %v45_v16, %v54_v15 }
  0x7c   :  { %v62_v18 = vpop.permute.xlu0 %61 }
  0x7d   :  { %v71_v19 = vsel %vm70_vm1, %v68_v17, %v62_v18 }
  0x7e   :  { %1014 = vmatmul.msk.f32.vlgmr.msra.gmra.mxu0 %vm89_vm2, %v71_v19 }
  0x84   :  { %v1321_v33 = vpop.permute.xlu0 %181 }
  0xfb   :  { %v113_v21 = vpop.f32.mrf.mxu0 }
  0xfc   :  { %v1291_v22 = vadd.f32 %v1288_v20, %v113_v21 }
  0xfe   :  { %130 = vrot.lane.b32.xlu0 %v1291_v22, %s1136_s27  ;;  %139 = vrot.lane.b32.xlu2 %v1291_v22, %s1137_s28  ;;  %v184_v34 = vmul.f32 %v1321_v33, %v1291_v22  ;;  %v154_v46 = vmul.f32 %v1275_v14, %v1291_v22 }
  0xff   :  { %124 = vrot.lane.b32.xlu1 %v1291_v22, %s1138_s30 }
 0x106   :  { %172 = vrot.lane.b32.xlu2 %v1291_v22, %s1139_s14 }
 0x107   :  { %164 = vrot.lane.b32.xlu1 %v1291_v22, %s1140_s5 }
 0x158   :  { %v140_v23 = vpop.permute.xlu2 %139 }
 0x160   :  { %v173_v25 = vpop.permute.xlu2 %172 }
 0x161   :  { %v178_v26 = vsel %vm151_vm3, %v173_v25, %v140_v23 }
 0x162   :  { %v198_v27 = vmul.f32 %v178_v26, %v1306_v24 }
 0x164   :  { %202 = vrot.lane.b32.xlu2 %v198_v27, %s1134_s29 }
 0x170   :  { %v131_v40 = vpop.permute.xlu0 %130 }
 0x171   :  { %v125_v28 = vpop.permute.xlu1 %124 }
 0x172   :  { %v137_v42 = vsel %vm136_vm4, %v125_v28, %v131_v40 }
 0x173   :  { %v156_v45 = vmul.f32 %v137_v42, %v1314_v30 }
 0x175   :  { %v158_v48 = vsub.f32 %v154_v46, %v156_v45 }
 0x179   :  { %v165_v29 = vpop.permute.xlu1 %164 }
 0x17a   :  { %v170_v31 = vsel %vm136_vm4, %v165_v29, %v125_v28 }
 0x17b   :  { %v186_v32 = vmul.f32 %v170_v31, %v1314_v30 }
 0x17d   :  { %190 = vrot.lane.b32.xlu1 %v186_v32, %s1134_s29 }
 0x185   :  { %145 = vrot.lane.b32.xlu1 %v1291_v22, %s1141_s8 }
 0x1be   :  { %v203_v37 = vpop.permute.xlu2 %202 }
 0x1ef   :  { %v191_v35 = vpop.permute.xlu1 %190 }
 0x1f0   :  { %v196_v36 = vsub.f32 %v184_v34, %v191_v35 }
 0x1f2   :  { %v1325_v38 = vadd.f32 %v203_v37, %v196_v36 }
 0x1f4   :  { %216 = vrot.lane.b32.xlu2 %v1325_v38, %s1142_s7 }
 0x1f7   :  { %v146_v41 = vpop.permute.xlu1 %145 }
 0x1f8   :  { %v152_v44 = vsel %vm151_vm3, %v140_v23, %v146_v41 }
 0x1f9   :  { %v160_v47 = vmul.f32 %v152_v44, %v1306_v24 }
 0x1fb   :  { %v1347_v49 = vadd.f32 %v160_v47, %v158_v48 }
 0x1fc   :  { %270 = vrot.lane.b32.xlu2 %v1291_v22, %s1135_s25 }
 0x204   :  { %55 = vrot.lane.b32.xlu2 %v48_v39, %s1134_s29 }
 0x20c   :  { %298 = vrot.lane.b32.xlu2 %v1325_v38, %s1143_s21 }
 0x214   :  { %63 = vrot.lane.b32.xlu2 %v50_v43, %s1135_s25 }
 0x21c   :  { %296 = vrot.lane.b32.xlu2 %v1347_v49, %s1144_s2 }
 0x24e   :  { %v217_v50 = vpop.permute.xlu2 %216 }
 0x24f   :  { %1016 = vmatpush.xpose.msk.msra.mxu1 %vm218_vm5, %v217_v50 }
 0x252   :  { %1017 = vmatmul.msk.f32.vlgmr.msra.gmra.mxu1 %vm218_vm5, %v1347_v49 }
 0x256   :  { %v271_v51 = vpop.permute.xlu2 %270 }
 0x257   :  { %291 = vmatpush.msra.mxu3 %v271_v51 }
 0x25e   :  { %v56_v52 = vpop.permute.xlu2 %55 }
 0x25f   :  { %v69_v55 = vsel %vm67_vm0, %v46_v54, %v56_v52 }
 0x266   :  { %v299_v53 = vpop.permute.xlu2 %298 }
 0x267   :  { %1019 = vmatpush.xpose.msk.msrb.mxu3 %vm218_vm5, %v299_v53 }
 0x26e   :  { %v64_v56 = vpop.permute.xlu2 %63 }
 0x26f   :  { %v72_v57 = vsel %vm70_vm1, %v69_v55, %v64_v56 }
 0x270   :  { %1015 = vmatmul.msk.f32.gmra.mxu0 %vm89_vm2, %v72_v57 }
 0x276   :  { %v297_v9 = vpop.permute.xlu2 %296 }
 0x2cf   :  { %v241_v61 = vpop.f32.mrf.mxu1 }
 0x2d0   :  { %v244_v63 = vmul.f32 0.35355338, %v241_v61 }
 0x2d2   :  { %v245_v0 = vsel %vm1361_vm6, %v244_v63, -1e+30 }
 0x2d3   :  { %v246_v1 = vsel %vm218_vm5, %v245_v0, -inf }
 0x2d4   :  { %247 = vmax.xlane.f32.xlu0 %v246_v1 }
 0x2ed   :  { %v116_v2 = vpop.f32.mrf.mxu0 }
 0x2ee   :  { %v1369_v3 = vadd.f32 %v1288_v20, %v116_v2 }
 0x2f0   :  { %166 = vrot.lane.b32.xlu0 %v1369_v3, %s1140_s5  ;;  %126 = vrot.lane.b32.xlu2 %v1369_v3, %s1138_s30  ;;  %v155_v37 = vmul.f32 %v1275_v14, %v1369_v3  ;;  %v185_v47 = vmul.f32 %v1321_v33, %v1369_v3  ;;  %s1153_s30 = smov 8  }
 0x2f8   :  { %174 = vrot.lane.b32.xlu2 %v1369_v3, %s1139_s14  ;;  %s1154_s14 = smov 16  }
 0x347   :  { %v248_v4 = vpop.xlane.xlu0 %247 }
 0x348   :  { %v249_v5 = vsub.f32 %v245_v0, %v248_v4 }
 0x34a   :  { %v250_v6 = vmul.f32 1.442695, %v249_v5  ;;  %v127_v10 = vpop.permute.xlu2 %126 }
 0x34c   :  { %1070 = vpow2.f32 %v250_v6 }
 0x352   :  { %v1071_v7 = vpop.eup %1070  ;;  %v175_v29 = vpop.permute.xlu2 %174 }
 0x353   :  { %v252_v8 = vsel %vm218_vm5, %v1071_v7, 0.0 }
 0x354   :  { %253 = vadd.xlane.f32.xlu1 %v252_v8 }
 0x362   :  { %v167_v11 = vpop.permute.xlu0 %166 }
 0x363   :  { %v171_v12 = vsel %vm136_vm4, %v167_v11, %v127_v10 }
 0x364   :  { %v187_v13 = vmul.f32 %v171_v12, %v1314_v30 }
 0x366   :  { %192 = vrot.lane.b32.xlu0 %v187_v13, %s1134_s29 }
 0x36d   :  { %141 = vrot.lane.b32.xlu1 %v1369_v3, %s1137_s28  ;;  %s1151_s28 = smov 104  }
 0x375   :  { %132 = vrot.lane.b32.xlu1 %v1369_v3, %s1136_s27  ;;  %s1150_s27 = smov 72  }
 0x37d   :  { %147 = vrot.lane.b32.xlu1 %v1369_v3, %s1141_s8 }
 0x385   :  { %350 = vrot.lane.b32.xlu1 %v1291_v22, %s1145_s1 }
 0x3c7   :  { %v254_v15 = vpop.xlane.xlu1 %253 }
 0x3c8   :  { %1072 = vrcp.f32 %v254_v15  ;;  %v266_v19 = vand.u32 2147483648, %v254_v15  ;;  %v264_v21 = vand.u32 2147483647, %v254_v15  ;;  %vm260_vm8 = vweird.f32 %v254_v15 }
 0x3ca   :  { %v267_v25 = vor.u32 1.1754944e-38, %v266_v19  ;;  %vm265_vm10 = vcmp.eq.f32.partialorder %v264_v21, 8.507059e+37 }
 0x3ce   :  { %v1073_v16 = vpop.eup %1072 }
 0x3cf   :  { %v256_v17 = vmul.f32 %v1073_v16, %v254_v15  ;;  %vm261_vm7 = vweird.f32 %v1073_v16 }
 0x3d0   :  { %vm262_vm9 = vmor %vm260_vm8, %vm261_vm7 }
 0x3d1   :  { %v257_v18 = vsub.f32 1.0, %v256_v17 }
 0x3d3   :  { %v258_v20 = vmul.f32 %v1073_v16, %v257_v18 }
 0x3d5   :  { %v259_v23 = vadd.f32 %v1073_v16, %v258_v20 }
 0x3d7   :  { %v263_v26 = vsel %vm262_vm9, %v1073_v16, %v259_v23 }
 0x3d8   :  { %v268_v27 = vsel %vm265_vm10, %v267_v25, %v263_v26  ;;  %v193_v46 = vpop.permute.xlu0 %192 }
 0x3d9   :  { %v269_v28 = vmul.f32 %v1071_v7, %v268_v27  ;;  %v197_v48 = vsub.f32 %v185_v47, %v193_v46 }
 0x3db   :  { %1018 = vmatmul.msk.f32.vlgmr.msra.gmra.mxu3 %vm218_vm5, %v269_v28 }
 0x3df   :  { %v142_v31 = vpop.permute.xlu1 %141 }
 0x3e0   :  { %v179_v32 = vsel %vm151_vm3, %v175_v29, %v142_v31 }
 0x3e1   :  { %v199_v34 = vmul.f32 %v179_v32, %v1306_v24 }
 0x3e3   :  { %1020 = vmatmul.msk.f32.vlgmr.msrb.gmra.mxu3 %vm218_vm5, %v297_v9  ;;  %204 = vrot.lane.b32.xlu0 %v199_v34, %s1134_s29  ;;  %s1146_s29 = smov 48  }
 0x3e7   :  { %v133_v35 = vpop.permute.xlu1 %132 }
 0x3e8   :  { %v138_v36 = vsel %vm136_vm4, %v127_v10, %v133_v35 }
 0x3e9   :  { %v157_v39 = vmul.f32 %v138_v36, %v1314_v30 }
 0x3eb   :  { %v159_v40 = vsub.f32 %v155_v37, %v157_v39 }
 0x3ef   :  { %v148_v41 = vpop.permute.xlu1 %147 }
 0x3f0   :  { %v153_v42 = vsel %vm151_vm3, %v142_v31, %v148_v41 }
 0x3f1   :  { %v161_v43 = vmul.f32 %v153_v42, %v1306_v24 }
 0x3f3   :  { %v1400_v44 = vadd.f32 %v161_v43, %v159_v40 }
 0x3f7   :  { %v351_v45 = vpop.permute.xlu1 %350 }
 0x3f8   :  { %371 = vmatpush.msra.mxu2 %v351_v45 }
 0x455   :  { %v205_v50 = vpop.permute.xlu0 %204 }
 0x456   :  { %v1404_v51 = vadd.f32 %v205_v50, %v197_v48 }
 0x458   :  { %377 = vrot.lane.b32.xlu1 %v1404_v51, %s1142_s7 }
 0x45e   :  { %v1408_v14 = vpop.f32.mrf.mxu3 }
 0x460   :  { %456 = vrot.lane.b32.xlu1 %v1400_v44, %s1144_s2 }
 0x466   :  { %v321_v24 = vpop.f32.mrf.mxu3 }
 0x467   :  { %v324_v30 = vmul.f32 0.35355338, %v321_v24 }
 0x469   :  { %v325_v52 = vsel %vm1361_vm6, %v324_v30, -1e+30 }
 0x46a   :  { %v326_v53 = vsel %vm218_vm5, %v325_v52, -inf }
 0x46b   :  { %327 = vmax.xlane.f32.xlu2 %v326_v53 }
 0x483   :  { %458 = vrot.lane.b32.xlu2 %v1404_v51, %s1143_s21 }
 0x4ca   :  { %v378_v33 = vpop.permute.xlu1 %377 }
 0x4cb   :  { %1022 = vmatpush.xpose.msk.msrb.mxu1 %vm218_vm5, %v378_v33 }
 0x4ce   :  { %1023 = vmatmul.msk.f32.vlgmr.msrb.gmra.mxu1 %vm218_vm5, %v1400_v44 }
 0x4d2   :  { %v457_v15 = vpop.permute.xlu1 %456 }
 0x4de   :  { %v328_v54 = vpop.xlane.xlu2 %327 }
 0x4df   :  { %v329_v55 = vsub.f32 %v325_v52, %v328_v54 }
 0x4e1   :  { %v330_v56 = vmul.f32 1.442695, %v329_v55 }
 0x4e3   :  { %1074 = vpow2.f32 %v330_v56 }
 0x4e6   :  { %v459_v57 = vpop.permute.xlu2 %458 }
 0x4e7   :  { %1025 = vmatpush.xpose.msk.msrb.mxu2 %vm218_vm5, %v459_v57 }
 0x4e9   :  { %v1075_v58 = vpop.eup %1074 }
 0x4ea   :  { %v332_v59 = vsel %vm218_vm5, %v1075_v58, 0.0 }
 0x4eb   :  { %333 = vadd.xlane.f32.xlu0 %v332_v59 }
 0x4ff   :  { %430 = vrot.lane.b32.xlu0 %v1291_v22, %s1146_s29 }
 0x507   :  { %510 = vrot.lane.b32.xlu0 %v1291_v22, %s1147_s26 }
 0x54b   :  { %v401_v60 = vpop.f32.mrf.mxu1 }
 0x54c   :  { %v404_v61 = vmul.f32 0.35355338, %v401_v60 }
 0x54e   :  { %v405_v63 = vsel %vm1361_vm6, %v404_v61, -1e+30 }
 0x54f   :  { %v406_v0 = vsel %vm218_vm5, %v405_v63, -inf }
 0x550   :  { %407 = vmax.xlane.f32.xlu1 %v406_v0 }
 0x55e   :  { %v334_v1 = vpop.xlane.xlu0 %333 }
 0x55f   :  { %1076 = vrcp.f32 %v334_v1  ;;  %v346_v6 = vand.u32 2147483648, %v334_v1  ;;  %v344_v22 = vand.u32 2147483647, %v334_v1  ;;  %vm340_vm12 = vweird.f32 %v334_v1 }
 0x561   :  { %v347_v9 = vor.u32 1.1754944e-38, %v346_v6  ;;  %vm345_vm14 = vcmp.eq.f32.partialorder %v344_v22, 8.507059e+37 }
 0x565   :  { %v1077_v2 = vpop.eup %1076 }
 0x566   :  { %v336_v4 = vmul.f32 %v1077_v2, %v334_v1  ;;  %vm341_vm11 = vweird.f32 %v1077_v2 }
 0x567   :  { %vm342_vm13 = vmor %vm340_vm12, %vm341_vm11 }
 0x568   :  { %v337_v5 = vsub.f32 1.0, %v336_v4 }
 0x569   :  { %555 = vrot.lane.b32.xlu1 %v1325_v38, %s1148_s4 }
 0x56a   :  { %v338_v7 = vmul.f32 %v1077_v2, %v337_v5 }
 0x56c   :  { %v339_v8 = vadd.f32 %v1077_v2, %v338_v7 }
 0x56e   :  { %v343_v10 = vsel %vm342_vm13, %v1077_v2, %v339_v8 }
 0x56f   :  { %v348_v11 = vsel %vm345_vm14, %v347_v9, %v343_v10 }
 0x570   :  { %v349_v12 = vmul.f32 %v1075_v58, %v348_v11 }
 0x571   :  { %v431_v13 = vpop.permute.xlu0 %430 }
 0x572   :  { %1021 = vmatmul.msk.f32.vlgmr.msra.gmra.mxu2 %vm218_vm5, %v349_v12  ;;  %451 = vmatpush.msra.mxu3 %v431_v13 }
 0x579   :  { %v511_v16 = vpop.permute.xlu0 %510 }
 0x57a   :  { %1026 = vmatmul.msk.f32.vlgmr.msrb.gmra.mxu2 %vm218_vm5, %v457_v15  ;;  %531 = vmatpush.msra.mxu1 %v511_v16 }
 0x5c3   :  { %v408_v17 = vpop.xlane.xlu1 %407 }
 0x5c4   :  { %v409_v18 = vsub.f32 %v405_v63, %v408_v17 }
 0x5c6   :  { %v410_v19 = vmul.f32 1.442695, %v409_v18 }
 0x5c8   :  { %1078 = vpow2.f32 %v410_v19 }
 0x5ce   :  { %v1079_v20 = vpop.eup %1078 }
 0x5cf   :  { %v412_v21 = vsel %vm218_vm5, %v1079_v20, 0.0 }
 0x5d0   :  { %413 = vadd.xlane.f32.xlu2 %v412_v21 }
 0x5db   :  { %v556_v23 = vpop.permute.xlu1 %555 }
 0x5dc   :  { %1028 = vmatpush.xpose.msk.msrb.mxu3 %vm218_vm5, %v556_v23 }
 0x5e8   :  { %553 = vrot.lane.b32.xlu2 %v1347_v49, %s1149_s6 }
 0x5f5   :  { %v1437_v25 = vpop.f32.mrf.mxu2 }
 0x5fd   :  { %v481_v26 = vpop.f32.mrf.mxu2 }
 0x5fe   :  { %v484_v27 = vmul.f32 0.35355338, %v481_v26 }
 0x600   :  { %v485_v28 = vsel %vm1361_vm6, %v484_v27, -1e+30 }
 0x601   :  { %v486_v29 = vsel %vm218_vm5, %v485_v28, -inf }
 0x602   :  { %487 = vmax.xlane.f32.xlu0 %v486_v29 }
 0x616   :  { %635 = vrot.lane.b32.xlu0 %v1325_v38, %s1150_s27 }
 0x643   :  { %v414_v31 = vpop.xlane.xlu2 %413 }
 0x644   :  { %1080 = vrcp.f32 %v414_v31  ;;  %v426_v36 = vand.u32 2147483648, %v414_v31  ;;  %v424_v39 = vand.u32 2147483647, %v414_v31  ;;  %vm420_vm1 = vweird.f32 %v414_v31 }
 0x646   :  { %v427_v41 = vor.u32 1.1754944e-38, %v426_v36  ;;  %vm425_vm3 = vcmp.eq.f32.partialorder %v424_v39, 8.507059e+37 }
 0x64a   :  { %v1081_v32 = vpop.eup %1080 }
 0x64b   :  { %v416_v34 = vmul.f32 %v1081_v32, %v414_v31  ;;  %vm421_vm15 = vweird.f32 %v1081_v32  ;;  %v554_v38 = vpop.permute.xlu2 %553 }
 0x64c   :  { %vm422_vm2 = vmor %vm420_vm1, %vm421_vm15 }
 0x64d   :  { %v417_v35 = vsub.f32 1.0, %v416_v34 }
 0x64f   :  { %v418_v37 = vmul.f32 %v1081_v32, %v417_v35 }
 0x651   :  { %v419_v40 = vadd.f32 %v1081_v32, %v418_v37 }
 0x653   :  { %v423_v42 = vsel %vm422_vm2, %v1081_v32, %v419_v40 }
 0x654   :  { %v428_v43 = vsel %vm425_vm3, %v427_v41, %v423_v42 }
 0x655   :  { %v429_v45 = vmul.f32 %v1079_v20, %v428_v43 }
 0x657   :  { %1024 = vmatmul.msk.f32.vlgmr.msra.gmra.mxu3 %vm218_vm5, %v429_v45 }
 0x65f   :  { %1029 = vmatmul.msk.f32.vlgmr.msrb.gmra.mxu3 %vm218_vm5, %v554_v38 }
 0x675   :  { %v488_v46 = vpop.xlane.xlu0 %487 }
 0x676   :  { %v489_v47 = vsub.f32 %v485_v28, %v488_v46 }
 0x678   :  { %v490_v48 = vmul.f32 1.442695, %v489_v47 }
 0x67a   :  { %1082 = vpow2.f32 %v490_v48 }
 0x680   :  { %v1083_v50 = vpop.eup %1082 }
 0x681   :  { %v492_v24 = vsel %vm218_vm5, %v1083_v50, 0.0 }
 0x682   :  { %493 = vadd.xlane.f32.xlu0 %v492_v24 }
 0x688   :  { %v636_v30 = vpop.permute.xlu0 %635 }
 0x689   :  { %1031 = vmatpush.xpose.msk.msrb.mxu1 %vm218_vm5, %v636_v30 }
 0x696   :  { %633 = vrot.lane.b32.xlu0 %v1347_v49, %s1151_s28 }
 0x6da   :  { %v1450_v52 = vpop.f32.mrf.mxu3 }
 0x6e2   :  { %v578_v53 = vpop.f32.mrf.mxu3 }
 0x6e3   :  { %v581_v33 = vmul.f32 0.35355338, %v578_v53 }
 0x6e5   :  { %v582_v54 = vsel %vm1361_vm6, %v581_v33, -1e+30 }
 0x6e6   :  { %v583_v55 = vsel %vm218_vm5, %v582_v54, -inf }
 0x6e7   :  { %584 = vmax.xlane.f32.xlu1 %v583_v55 }
 0x6f5   :  { %v494_v56 = vpop.xlane.xlu0 %493 }
 0x6f6   :  { %1084 = vrcp.f32 %v494_v56  ;;  %v506_v60 = vand.u32 2147483648, %v494_v56  ;;  %v504_v61 = vand.u32 2147483647, %v494_v56  ;;  %vm500_vm7 = vweird.f32 %v494_v56 }
 0x6f8   :  { %v507_v0 = vor.u32 1.1754944e-38, %v506_v60  ;;  %vm505_vm9 = vcmp.eq.f32.partialorder %v504_v61, 8.507059e+37 }
 0x6fc   :  { %v1085_v57 = vpop.eup %1084 }
 0x6fd   :  { %v496_v58 = vmul.f32 %v1085_v57, %v494_v56  ;;  %vm501_vm4 = vweird.f32 %v1085_v57 }
 0x6fe   :  { %vm502_vm8 = vmor %vm500_vm7, %vm501_vm4 }
 0x6ff   :  { %v497_v59 = vsub.f32 1.0, %v496_v58 }
 0x700   :  { %687 = vrot.lane.b32.xlu1 %v1369_v3, %s1145_s1 }
 0x701   :  { %v498_v49 = vmul.f32 %v1085_v57, %v497_v59 }
 0x703   :  { %v499_v63 = vadd.f32 %v1085_v57, %v498_v49 }
 0x705   :  { %v503_v1 = vsel %vm502_vm8, %v1085_v57, %v499_v63 }
 0x706   :  { %v508_v2 = vsel %vm505_vm9, %v507_v0, %v503_v1 }
 0x707   :  { %v509_v4 = vmul.f32 %v1083_v50, %v508_v2 }
 0x708   :  { %v634_v5 = vpop.permute.xlu0 %633 }
 0x709   :  { %1027 = vmatmul.msk.f32.vlgmr.msra.gmra.mxu1 %vm218_vm5, %v509_v4 }
 0x711   :  { %1032 = vmatmul.msk.f32.vlgmr.msrb.gmra.mxu1 %vm218_vm5, %v634_v5 }
 0x75a   :  { %v585_v6 = vpop.xlane.xlu1 %584 }
 0x75b   :  { %v586_v7 = vsub.f32 %v582_v54, %v585_v6 }
 0x75d   :  { %v587_v22 = vmul.f32 1.442695, %v586_v7 }
 0x75f   :  { %1086 = vpow2.f32 %v587_v22 }
 0x765   :  { %v1087_v8 = vpop.eup %1086 }
 0x766   :  { %v589_v9 = vsel %vm218_vm5, %v1087_v8, 0.0 }
 0x767   :  { %590 = vadd.xlane.f32.xlu2 %v589_v9 }
 0x772   :  { %v688_v10 = vpop.permute.xlu1 %687 }
 0x773   :  { %708 = vmatpush.msra.mxu3 %v688_v10 }
 0x77f   :  { %715 = vrot.lane.b32.xlu2 %v1404_v51, %s1148_s4  ;;  %s1157_s4 = smov 128  }
 0x786   :  { %v1462_v11 = vpop.f32.mrf.mxu1 }
 0x78e   :  { %v658_v12 = vpop.f32.mrf.mxu1 }
 0x78f   :  { %v661_v13 = vmul.f32 0.35355338, %v658_v12 }
 0x791   :  { %v662_v15 = vsel %vm1361_vm6, %v661_v13, -1e+30 }
 0x792   :  { %v663_v16 = vsel %vm218_vm5, %v662_v15, -inf }
 0x793   :  { %664 = vmax.xlane.f32.xlu0 %v663_v16 }
 0x7a7   :  { %607 = vrot.lane.b32.xlu0 %v1369_v3, %s1135_s25  ;;  %s1152_s25 = smov 24  }
 0x7af   :  { %795 = vrot.lane.b32.xlu0 %v1404_v51, %s1150_s27 }
 0x7b7   :  { %793 = vrot.lane.b32.xlu0 %v1400_v44, %s1151_s28 }
 0x7da   :  { %v591_v17 = vpop.xlane.xlu2 %590 }
 0x7db   :  { %1088 = vrcp.f32 %v591_v17  ;;  %v603_v29 = vand.u32 2147483648, %v591_v17  ;;  %vm597_vm11 = vweird.f32 %v591_v17  ;;  %v601_v32 = vand.u32 2147483647, %v591_v17 }
 0x7dd   :  { %v604_v35 = vor.u32 1.1754944e-38, %v603_v29  ;;  %vm602_vm13 = vcmp.eq.f32.partialorder %v601_v32, 8.507059e+37 }
 0x7e1   :  { %v1089_v18 = vpop.eup %1088 }
 0x7e2   :  { %v593_v19 = vmul.f32 %v1089_v18, %v591_v17  ;;  %vm598_vm10 = vweird.f32 %v1089_v18  ;;  %v716_v40 = vpop.permute.xlu2 %715 }
 0x7e3   :  { %vm599_vm12 = vmor %vm597_vm11, %vm598_vm10 }
 0x7e4   :  { %v594_v21 = vsub.f32 1.0, %v593_v19 }
 0x7e6   :  { %v595_v27 = vmul.f32 %v1089_v18, %v594_v21 }
 0x7e8   :  { %v596_v28 = vadd.f32 %v1089_v18, %v595_v27 }
 0x7ea   :  { %v600_v34 = vsel %vm599_vm12, %v1089_v18, %v596_v28  ;;  %vm549_vm12 = vcmask 130048  }
 0x7eb   :  { %v605_v36 = vsel %vm602_vm13, %v604_v35, %v600_v34  ;;  %vm551_vm13 = vcmask 195584  }
 0x7ec   :  { %v606_v39 = vmul.f32 %v1087_v8, %v605_v36 }
 0x806   :  { %v665_v20 = vpop.xlane.xlu0 %664 }
 0x807   :  { %v666_v23 = vsub.f32 %v662_v15, %v665_v20 }
 0x809   :  { %v667_v26 = vmul.f32 1.442695, %v666_v23 }
 0x80b   :  { %1090 = vpow2.f32 %v667_v26 }
 0x811   :  { %v1091_v31 = vpop.eup %1090 }
 0x812   :  { %v669_v51 = vsel %vm218_vm5, %v1091_v31, 0.0 }
 0x813   :  { %670 = vadd.xlane.f32.xlu1 %v669_v51 }
 0x819   :  { %v608_v37 = vpop.permute.xlu0 %607 }
 0x81a   :  { %628 = vmatpush.msra.mxu2 %v608_v37 }
 0x81b   :  { %1030 = vmatmul.msk.f32.vlgmr.msra.gmra.mxu2 %vm218_vm5, %v606_v39 }
 0x81c   :  { %1034 = vmatpush.xpose.msk.msrb.mxu2 %vm218_vm5, %v716_v40 }
 0x821   :  { %v796_v41 = vpop.permute.xlu0 %795 }
 0x822   :  { %1037 = vmatpush.xpose.msk.msrb.mxu3 %vm218_vm5, %v796_v41 }
 0x829   :  { %v794_v54 = vpop.permute.xlu0 %793 }
 0x82c   :  { %713 = vrot.lane.b32.xlu1 %v1400_v44, %s1149_s6 }
 0x886   :  { %v671_v42 = vpop.xlane.xlu1 %670 }
 0x887   :  { %1092 = vrcp.f32 %v671_v42  ;;  %v683_v46 = vand.u32 2147483648, %v671_v42  ;;  %v681_v48 = vand.u32 2147483647, %v671_v42  ;;  %vm677_vm15 = vweird.f32 %v671_v42 }
 0x889   :  { %v684_v24 = vor.u32 1.1754944e-38, %v683_v46  ;;  %vm682_vm2 = vcmp.eq.f32.partialorder %v681_v48, 8.507059e+37 }
 0x88d   :  { %v1093_v43 = vpop.eup %1092 }
 0x88e   :  { %v673_v45 = vmul.f32 %v1093_v43, %v671_v42  ;;  %vm678_vm14 = vweird.f32 %v1093_v43  ;;  %v888_v42 = vld [vmem:[%s1554_s0] sm:$0xff] }
 0x88f   :  { %vm679_vm1 = vmor %vm677_vm15, %vm678_vm14 }
 0x890   :  { %v674_v38 = vsub.f32 1.0, %v673_v45 }
 0x892   :  { %v675_v47 = vmul.f32 %v1093_v43, %v674_v38 }
 0x894   :  { %v676_v50 = vadd.f32 %v1093_v43, %v675_v47 }
 0x896   :  { %v680_v30 = vsel %vm679_vm1, %v1093_v43, %v676_v50 }
 0x897   :  { %v685_v53 = vsel %vm682_vm2, %v684_v24, %v680_v30 }
 0x898   :  { %v686_v33 = vmul.f32 %v1091_v31, %v685_v53 }
 0x89a   :  { %1033 = vmatmul.msk.f32.vlgmr.msra.gmra.mxu3 %vm218_vm5, %v686_v33 }
 0x89e   :  { %v714_v44 = vpop.permute.xlu1 %713  ;;  %v1482_v55 = vpop.f32.mrf.mxu2 }
 0x89f   :  { %1035 = vmatmul.msk.f32.vlgmr.msrb.gmra.mxu2 %vm218_vm5, %v714_v44 }
 0x8a2   :  { %1038 = vmatmul.msk.f32.vlgmr.msrb.gmra.mxu3 %vm218_vm5, %v794_v54 }
 0x91d   :  { %v710_v56 = vpop.f32.mrf.mxu3 }
 0x922   :  { %v738_v57 = vpop.f32.mrf.mxu2 }
 0x923   :  { %v741_v58 = vmul.f32 0.35355338, %v738_v57 }
 0x925   :  { %v818_v59 = vpop.f32.mrf.mxu3  ;;  %v742_v60 = vsel %vm1361_vm6, %v741_v58, -1e+30 }
 0x926   :  { %v821_v49 = vmul.f32 0.35355338, %v818_v59  ;;  %v743_v61 = vsel %vm218_vm5, %v742_v60, -inf }
 0x927   :  { %744 = vmax.xlane.f32.xlu2 %v743_v61 }
 0x928   :  { %v822_v63 = vsel %vm1361_vm6, %v821_v49, -1e+30 }
 0x929   :  { %v823_v0 = vsel %vm218_vm5, %v822_v63, -inf }
 0x92a   :  { %824 = vmax.xlane.f32.xlu1 %v823_v0  ;;  %v889_v0 = vld [vmem:[%s1554_s0 + $0x8] sm:$0xff] }
 0x943   :  { %767 = vrot.lane.b32.xlu1 %v1369_v3, %s1146_s29 }
 0x94b   :  { %545 = vrot.lane.b32.xlu1 %v1462_v11, %s1152_s25 }
 0x99a   :  { %v745_v1 = vpop.xlane.xlu2 %744 }
 0x99b   :  { %v746_v2 = vsub.f32 %v742_v60, %v745_v1 }
 0x99d   :  { %v747_v4 = vmul.f32 1.442695, %v746_v2  ;;  %v825_v5 = vpop.xlane.xlu1 %824 }
 0x99e   :  { %v826_v6 = vsub.f32 %v822_v63, %v825_v5 }
 0x99f   :  { %1094 = vpow2.f32 %v747_v4 }
 0x9a0   :  { %v827_v7 = vmul.f32 1.442695, %v826_v6 }
 0x9a2   :  { %1096 = vpow2.f32 %v827_v7  ;;  %v958_v7 = vld [vmem:[%s1563_s9 + $0x18] sm:$0xff] }
 0x9a3   :  { %981 = vmatpush.msra.mxu2 %v958_v7 }
 0x9a5   :  { %v1095_v62 = vpop.eup %1094 }
 0x9a6   :  { %v749_v22 = vsel %vm218_vm5, %v1095_v62, 0.0 }
 0x9a7   :  { %750 = vadd.xlane.f32.xlu0 %v749_v22  ;;  %v955_v22 = vld [vmem:[%s1563_s9] sm:$0xff] }
 0x9a8   :  { %v1097_v8 = vpop.eup %1096 }
 0x9a9   :  { %v829_v9 = vsel %vm218_vm5, %v1097_v8, 0.0 }
 0x9aa   :  { %830 = vadd.xlane.f32.xlu2 %v829_v9 }
 0x9b5   :  { %v768_v10 = vpop.permute.xlu1 %767 }
 0x9b6   :  { %788 = vmatpush.msra.mxu1 %v768_v10 }
 0x9bb   :  { %847 = vrot.lane.b32.xlu0 %v1369_v3, %s1147_s26  ;;  %s1002_s26 = sshll.u32 %s1567_s13, 4  ;;  %s1003_s26 = int_to_ptr.hbm [resolvable:$true] %s1002_s26 }
 0x9bd   :  { %v546_v43 = vpop.permute.xlu1 %545 }
 0x9c2   :  { %537 = vrot.lane.b32.xlu2 %v1437_v25, %s1153_s30 }
 0x9c3   :  { %541 = vrot.lane.b32.xlu0 %v1450_v52, %s1154_s14 }
 0x9ca   :  { %874 = vrot.lane.b32.xlu2 %v710_v56, %s1153_s30 }
 0xa1a   :  { %v751_v11 = vpop.xlane.xlu0 %750 }
 0xa1b   :  { %1098 = vrcp.f32 %v751_v11  ;;  %v763_v18 = vand.u32 2147483648, %v751_v11  ;;  %v761_v20 = vand.u32 2147483647, %v751_v11  ;;  %vm757_vm3 = vweird.f32 %v751_v11 }
 0xa1d   :  { %v831_v12 = vpop.xlane.xlu2 %830  ;;  %v764_v52 = vor.u32 1.1754944e-38, %v763_v18  ;;  %vm762_vm8 = vcmp.eq.f32.partialorder %v761_v20, 8.507059e+37  ;;  %v1067_v18 = vld [vmem:[%s1565_s11] ss:$0 sm:$0xff] }
 0xa1e   :  { %1100 = vrcp.f32 %v831_v12  ;;  %v843_v23 = vand.u32 2147483648, %v831_v12  ;;  %v841_v27 = vand.u32 2147483647, %v831_v12  ;;  %vm837_vm9 = vweird.f32 %v831_v12  ;;  %v1068_v20 = vld [vmem:[%s1566_s12] ss:$0 sm:$0xff] }
 0xa20   :  { %v844_v32 = vor.u32 1.1754944e-38, %v843_v23  ;;  %vm842_vm11 = vcmp.eq.f32.partialorder %v841_v27, 8.507059e+37 }
 0xa21   :  { %v1099_v13 = vpop.eup %1098 }
 0xa22   :  { %v753_v15 = vmul.f32 %v1099_v13, %v751_v11  ;;  %vm758_vm6 = vweird.f32 %v1099_v13 }
 0xa23   :  { %vm759_vm4 = vmor %vm757_vm3, %vm758_vm6 }
 0xa24   :  { %v1101_v16 = vpop.eup %1100  ;;  %v754_v17 = vsub.f32 1.0, %v753_v15 }
 0xa25   :  { %v833_v3 = vmul.f32 %v1101_v16, %v831_v12  ;;  %vm838_vm7 = vweird.f32 %v1101_v16  ;;  %v538_v39 = vpop.permute.xlu2 %537 }
 0xa26   :  { %v755_v19 = vmul.f32 %v1099_v13, %v754_v17  ;;  %vm839_vm10 = vmor %vm837_vm9, %vm838_vm7  ;;  %v548_v40 = vsel %vm218_vm5, %v1408_v14, %v538_v39  ;;  %v1155_v14 = vmov 32.0  }
 0xa27   :  { %v834_v25 = vsub.f32 1.0, %v833_v3  ;;  %1102 = vrcp.f32 %v1155_v14 }
 0xa28   :  { %v756_v21 = vadd.f32 %v1099_v13, %v755_v19 }
 0xa29   :  { %v835_v26 = vmul.f32 %v1101_v16, %v834_v25 }
 0xa2a   :  { %v760_v28 = vsel %vm759_vm4, %v1099_v13, %v756_v21 }
 0xa2b   :  { %v765_v29 = vsel %vm762_vm8, %v764_v52, %v760_v28  ;;  %v836_v31 = vadd.f32 %v1101_v16, %v835_v26 }
 0xa2c   :  { %v766_v51 = vmul.f32 %v1095_v62, %v765_v29  ;;  %v956_v62 = vld [vmem:[%s1563_s9 + $0x8] sm:$0xff]  ;;  %v1069_v29 = vld [vmem:[%s1564_s10] ss:$0 sm:$0xff]  ;;  %s1156_s10 = smov [#allocation2]  }
 0xa2d   :  { %v848_v34 = vpop.permute.xlu0 %847  ;;  %v840_v35 = vsel %vm839_vm10, %v1101_v16, %v836_v31  ;;  %v1103_v24 = vpop.eup %1102  ;;  %s1000_s12 = sshll.u32 %s1156_s10, 4  ;;  %s1001_s12 = int_to_ptr.vmem [resolvable:$true] %s1000_s12 }
 0xa2e   :  { %1036 = vmatmul.msk.f32.vlgmr.msra.gmra.mxu1 %vm218_vm5, %v766_v51  ;;  %868 = vmatpush.msrb.mxu0 %v848_v34  ;;  %v845_v36 = vsel %vm842_vm11, %v844_v32, %v840_v35  ;;  %v899_v30 = vmul.f32 32.0, %v1103_v24  ;;  %v875_v33 = vpop.permute.xlu2 %874  ;;  %vm903_vm14 = vweird.f32 %v1103_v24 }
 0xa2f   :  { %v846_v37 = vmul.f32 %v1097_v8, %v845_v36  ;;  %v885_v63 = vsel %vm218_vm5, %v1482_v55, %v875_v33  ;;  %v957_v55 = vld [vmem:[%s1563_s9 + $0x10] sm:$0xff] }
 0xa30   :  { %v900_v53 = vsub.f32 1.0, %v899_v30  ;;  %982 = vmatpush.msra.mxu2 %v957_v55 }
 0xa31   :  { %1039 = vmatmul.msk.f32.vlgmr.msrb.gmra.mxu0 %vm218_vm5, %v846_v37 }
 0xa32   :  { %v901_v44 = vmul.f32 %v1103_v24, %v900_v53  ;;  %983 = vmatpush.msra.mxu2 %v956_v62 }
 0xa34   :  { %v902_v54 = vadd.f32 %v1103_v24, %v901_v44  ;;  %984 = vmatpush.msra.mxu2 %v955_v22 }
 0xa35   :  { %v542_v41 = vpop.permute.xlu0 %541 }
 0xa36   :  { %v550_v45 = vsel %vm549_vm12, %v548_v40, %v542_v41  ;;  %v904_v56 = vsel %vm903_vm14, %v1103_v24, %v902_v54 }
 0xa37   :  { %v552_v38 = vsel %vm551_vm13, %v550_v45, %v546_v43 }
 0xa38   :  { %v890_v46 = vadd.f32 %v888_v42, %v552_v38 }
 0xa3a   :  { %v892_v47 = vsel %vm67_vm0, %v890_v46, 0.0 }
 0xa3b   :  { %893 = vadd.xlane.f32.xlu2 %v892_v47 }
 0xaab   :  { %v790_v48 = vpop.f32.mrf.mxu1 }
 0xaac   :  { %878 = vrot.lane.b32.xlu0 %v790_v48, %s1154_s14 }
 0xaae   :  { %v870_v50 = vpop.f32.mrf.mxu0  ;;  %v894_v57 = vpop.xlane.xlu2 %893 }
 0xaaf   :  { %882 = vrot.lane.b32.xlu1 %v870_v50, %s1152_s25  ;;  %v905_v58 = vmul.f32 %v904_v56, %v894_v57 }
 0xab1   :  { %v907_v59 = vsub.f32 %v890_v46, %v905_v58 }
 0xab3   :  { %v909_v60 = vmul.f32 %v907_v59, %v907_v59 }
 0xab5   :  { %v911_v49 = vsel %vm67_vm0, %v909_v60, 0.0 }
 0xad9   :  { %912 = vadd.xlane.f32.xlu1 %v911_v49 }
 0xb1e   :  { %v879_v61 = vpop.permute.xlu0 %878 }
 0xb1f   :  { %v886_v1 = vsel %vm549_vm12, %v885_v63, %v879_v61 }
 0xb21   :  { %v883_v2 = vpop.permute.xlu1 %882 }
 0xb22   :  { %v887_v4 = vsel %vm551_vm13, %v886_v1, %v883_v2 }
 0xb23   :  { %v891_v5 = vadd.f32 %v889_v0, %v887_v4 }
 0xb25   :  { %v895_v6 = vsel %vm67_vm0, %v891_v5, 0.0 }
 0xb26   :  { %896 = vadd.xlane.f32.xlu0 %v895_v6 }
 0xb4c   :  { %v913_v8 = vpop.xlane.xlu1 %912 }
 0xb4d   :  { %v917_v9 = vmul.f32 %v913_v8, %v904_v56 }
 0xb4f   :  { %v919_v10 = vadd.f32 1e-05, %v917_v9 }
 0xb51   :  { %1104 = vrsqrt.f32 %v919_v10  ;;  %vm927_vm15 = vweird.f32 %v919_v10 }
 0xb57   :  { %v1105_v11 = vpop.eup %1104 }
 0xb58   :  { %v922_v12 = vmul.f32 %v1105_v11, %v919_v10  ;;  %vm928_vm5 = vweird.f32 %v1105_v11 }
 0xb59   :  { %vm929_vm1 = vmor %vm927_vm15, %vm928_vm5 }
 0xb5a   :  { %v923_v13 = vmul.f32 %v1105_v11, %v922_v12 }
 0xb5c   :  { %v924_v15 = vmul.f32 0.5, %v923_v13 }
 0xb5e   :  { %v925_v16 = vsub.f32 1.5, %v924_v15 }
 0xb60   :  { %v926_v17 = vmul.f32 %v1105_v11, %v925_v16 }
 0xb62   :  { %v930_v3 = vsel %vm929_vm1, %v1105_v11, %v926_v17 }
 0xb63   :  { %v941_v19 = vmul.f32 %v930_v3, %v907_v59 }
 0xb65   :  { %v947_v25 = vmul.f32 %v1067_v18, %v941_v19 }
 0xb67   :  { %v953_v21 = vadd.f32 %v1068_v20, %v947_v25 }
 0xb69   :  { %1040 = vmatmul.msk.f32.vlgmr.msra.gmra.mxu2 %vm67_vm0, %v953_v21 }
 0xb99   :  { %v897_v23 = vpop.xlane.xlu0 %896 }
 0xb9a   :  { %v906_v52 = vmul.f32 %v904_v56, %v897_v23 }
 0xb9c   :  { %v908_v26 = vsub.f32 %v891_v5, %v906_v52 }
 0xb9e   :  { %v910_v27 = vmul.f32 %v908_v26, %v908_v26 }
 0xba0   :  { %v914_v28 = vsel %vm67_vm0, %v910_v27, 0.0 }
 0xba1   :  { %915 = vadd.xlane.f32.xlu2 %v914_v28 }
 0xbec   :  { %v986_v31 = vpop.f32.mrf.mxu2 }
 0xbed   :  { %v987_v32 = vadd.f32 %v1069_v29, %v986_v31 }
 0xbef   :  { %v992_v51 = vadd.f32 %v987_v32, %v953_v21 }
 0xbf1   :  { %994 = vst.msk [vmem:[#allocation2] sm:$0xff] %vm67_vm0, %v992_v51 }
 0xc14   :  { %v916_v34 = vpop.xlane.xlu2 %915 }
 0xc15   :  { %v918_v35 = vmul.f32 %v916_v34, %v904_v56 }
 0xc17   :  { %v920_v36 = vadd.f32 1e-05, %v918_v35 }
 0xc19   :  { %1106 = vrsqrt.f32 %v920_v36  ;;  %vm937_vm6 = vweird.f32 %v920_v36 }
 0xc1f   :  { %v1107_v37 = vpop.eup %1106 }
 0xc20   :  { %v932_v39 = vmul.f32 %v1107_v37, %v920_v36  ;;  %vm938_vm2 = vweird.f32 %v1107_v37 }
 0xc21   :  { %vm939_vm3 = vmor %vm937_vm6, %vm938_vm2 }
 0xc22   :  { %v933_v40 = vmul.f32 %v1107_v37, %v932_v39 }
 0xc24   :  { %v934_v41 = vmul.f32 0.5, %v933_v40 }
 0xc26   :  { %v935_v42 = vsub.f32 1.5, %v934_v41 }
 0xc28   :  { %v936_v43 = vmul.f32 %v1107_v37, %v935_v42 }
 0xc2a   :  { %v940_v45 = vsel %vm939_vm3, %v1107_v37, %v936_v43 }
 0xc2b   :  { %v942_v38 = vmul.f32 %v940_v45, %v908_v26 }
 0xc2d   :  { %v948_v46 = vmul.f32 %v1067_v18, %v942_v38 }
 0xc2f   :  { %v954_v47 = vadd.f32 %v1068_v20, %v948_v46 }
 0xc31   :  { %1041 = vmatmul.msk.f32.gmra.mxu2 %vm67_vm0, %v954_v47 }
 0xcb4   :  { %v989_v48 = vpop.f32.mrf.mxu2 }
 0xcb5   :  { %v990_v50 = vadd.f32 %v1069_v29, %v989_v48 }
 0xcb7   :  { %v993_v14 = vadd.f32 %v990_v50, %v954_v47 }
 0xcb9   :  { %995 = vst.msk [vmem:[#allocation2 + $0x8] sm:$0xff] %vm67_vm0, %v993_v14 }
 0xcba   :  { %1008 = dma.vmem_to_hbm [thread:$0]  %s1001_s12, 256, %s1003_s26, [#allocation3], %s1157_s4, %s1157_s4, %s1153_s30  }
 0xcbb   :  { %1132 = dma.done.wait [#allocation3], 256  }
 0xcbc   :  { %1133 = vsyncadd [#allocation3], 4294967040 }
 0xcbd   :  { %1013 = vsyncpa [#allocation3], 1 }

</bundles_post_ra>
